<compile_context>
chip_gen: v6e
topology: v6e:2x2x1
jax: 0.10.0
libtpu: 0.0.40
codegen_flags: <defaults>
</compile_context>

<pallas_src>
import jax
import jax.numpy as jnp
from jax import lax
from jax.experimental import pallas as pl
from jax.experimental.pallas import tpu as pltpu

V_THRESHOLD = 1.0


# ------------------------------ Pallas kernel ------------------------------ #

def _bottleneck_kernel(x_ref, w1_ref, t1_ref, w2_ref, t2_ref, w3_ref, t3_ref,
                       out_ref, pad_ref, col_ref):
    """Fused conv1x1+IF -> conv3x3(im2col)+IF -> conv1x1+IF -> SEW 'ADD'.

    Grid = (N, H // TH). x block = one full image (re-used across row tiles);
    out block = one TH-row slab. pad_ref persists across grid steps and is
    (re)filled once per image at hi == 0.
    """
    _, h, w, cin = x_ref.shape
    width = w1_ref.shape[1]
    cout = w3_ref.shape[1]
    th_rows = out_ref.shape[1]
    hi = pl.program_id(1)

    # ---- once per image: stage 1 (1x1 conv + IF spike) into the padded scratch ----
    @pl.when(hi == 0)
    def _stage1():
        # Zero only the 1-pixel border; the interior is fully overwritten below.
        pad_ref[:, 0:1, :, :] = jnp.zeros((1, 1, w + 2, width), jnp.bfloat16)
        pad_ref[:, h + 1:h + 2, :, :] = jnp.zeros((1, 1, w + 2, width), jnp.bfloat16)
        pad_ref[:, :, 0:1, :] = jnp.zeros((1, h + 2, 1, width), jnp.bfloat16)
        pad_ref[:, :, w + 1:w + 2, :] = jnp.zeros((1, h + 2, 1, width), jnp.bfloat16)

        x2 = x_ref[...].reshape(h * w, cin)                          # bf16 spikes
        y1 = jnp.dot(x2, w1_ref[...], preferred_element_type=jnp.float32)
        sp1 = (y1 >= t1_ref[...]).astype(jnp.bfloat16)               # binary -> exact
        pad_ref[:, 1:h + 1, 1:w + 1, :] = sp1.reshape(1, h, w, width)

    # ---- per row tile: stage 2, 3x3 conv as a single K=9*width im2col matmul ----
    row0 = pl.multiple_of(hi * th_rows, th_rows)
    window = pad_ref[:, pl.ds(row0, th_rows + 2), :, :]              # (1,TH+2,W+2,width)
    p_tile = th_rows * w
    for di in range(3):
        for dj in range(3):
            tap = window[:, di:di + th_rows, dj:dj + w, :].reshape(p_tile, width)
            t = di * 3 + dj
            col_ref[:, t * width:(t + 1) * width] = tap              # bf16 scratch

    y2 = jnp.dot(col_ref[...], w2_ref[...], preferred_element_type=jnp.float32)
    sp2 = (y2 >= t2_ref[...]).astype(jnp.bfloat16)

    # ---- stage 3: 1x1 conv + IF spike, then SEW 'ADD' residual (bf16 exact) ----
    y3 = jnp.dot(sp2, w3_ref[...], preferred_element_type=jnp.float32)
    sp3 = (y3 >= t3_ref[...]).astype(jnp.bfloat16)
    x_tile = x_ref[:, pl.ds(row0, th_rows), :, :]                    # identity slab
    out_ref[...] = sp3.reshape(1, th_rows, w, cout) + x_tile         # values {0,1,2}


# -------------------------------- wrapper ----------------------------------- #

def _fold_params(params):
    """Fold BN scale into bf16 conv weights; fold BN shift into spike thresholds."""
    w1f = (params["w1"] * params["s1"]).astype(jnp.bfloat16)         # (Cin, width)
    w2f = (params["w2"] * params["s2"]).astype(jnp.bfloat16)         # (3,3,width,width)
    w3f = (params["w3"] * params["s3"]).astype(jnp.bfloat16)         # (width, Cout)
    t1 = (V_THRESHOLD - params["b1"]).astype(jnp.float32)            # (1, width)
    t2 = (V_THRESHOLD - params["b2"]).astype(jnp.float32)            # (1, width)
    t3 = (V_THRESHOLD - params["b3"]).astype(jnp.float32)            # (1, Cout)
    return w1f, t1, w2f, t2, w3f, t3


def _pick_row_tile(h, max_rows=8):
    for th in range(min(max_rows, h), 0, -1):
        if h % th == 0:
            return th
    return h


def _vmem_limit_bytes(h, w, cin, width, cout, th):
    bf16, f32 = 2, 4
    x_blk = h * w * cin * bf16
    out_blk = th * w * cout * bf16
    weights = (cin * width + 9 * width * width + width * cout) * bf16
    thr = (2 * width + cout) * f32
    pad = (h + 2) * (w + 2) * width * bf16
    col = th * w * 9 * width * bf16
    temps = (h * w * width + th * w * width + th * w * cout) * f32   # y1, y2, y3
    need = 2 * (x_blk + out_blk + weights + thr) + pad + col + 2 * temps
    # Clamp to v7x's 64 MiB physical VMEM so the same setting is safe on all gens.
    return int(min(max(need + (8 << 20), 32 << 20), 64 << 20))


def bottleneck_forward(x_nhwc, params, *, row_tile=8):
    n, h, w, cin = x_nhwc.shape
    width = params["w1"].shape[1]
    cout = params["w3"].shape[1]
    assert cin == cout, "downsample=None requires inplanes == planes*expansion"

    th = _pick_row_tile(h, row_tile)
    w1f, t1, w2f, t2, w3f, t3 = _fold_params(params)
    w2f_mat = w2f.reshape(9 * width, width)           # tap-major im2col weight
    x_bf16 = x_nhwc.astype(jnp.bfloat16)              # binary spikes -> exact in bf16

    grid = (n, h // th)
    in_specs = [
        pl.BlockSpec((1, h, w, cin), lambda ni, hi: (ni, 0, 0, 0)),   # one image
        pl.BlockSpec((cin, width), lambda ni, hi: (0, 0)),
        pl.BlockSpec((1, width), lambda ni, hi: (0, 0)),
        pl.BlockSpec((9 * width, width), lambda ni, hi: (0, 0)),
        pl.BlockSpec((1, width), lambda ni, hi: (0, 0)),
        pl.BlockSpec((width, cout), lambda ni, hi: (0, 0)),
        pl.BlockSpec((1, cout), lambda ni, hi: (0, 0)),
    ]
    out_specs = pl.BlockSpec((1, th, w, cout), lambda ni, hi: (ni, hi, 0, 0))
    scratch_shapes = [
        pltpu.VMEM((1, h + 2, w + 2, width), jnp.bfloat16),           # padded sp1
        pltpu.VMEM((th * w, 9 * width), jnp.bfloat16),                # im2col tile
    ]

    return pl.pallas_call(
        _bottleneck_kernel,
        out_shape=jax.ShapeDtypeStruct((n, h, w, cout), jnp.bfloat16),
        grid_spec=pltpu.PrefetchScalarGridSpec(
            num_scalar_prefetch=0,
            grid=grid,
            in_specs=in_specs,
            out_specs=out_specs,
            scratch_shapes=scratch_shapes),
        compiler_params=pltpu.CompilerParams(
            dimension_semantics=("parallel", "arbitrary"),
            vmem_limit_bytes=_vmem_limit_bytes(h, w, cin, width, cout, th)),
    )(x_bf16, w1f, t1, w2f_mat, t2, w3f, t3)


# ------------------------- deterministic parameters ------------------------- #

def _fold_bn(gamma, beta, mean, var, eps=1e-5):
    scale = gamma / jnp.sqrt(var + eps)
    shift = beta - mean * scale
    return scale[None, :], shift[None, :]


def _bn_params(key, c):
    k1, k2, k3, k4 = jax.random.split(key, 4)
    gamma = 1.0 + 0.1 * jax.random.normal(k1, (c,), jnp.float32)
    beta = 0.1 * jax.random.normal(k2, (c,), jnp.float32)
    mean = 0.1 * jax.random.normal(k3, (c,), jnp.float32)
    var = 0.5 + 0.5 * jnp.abs(jax.random.normal(k4, (c,), jnp.float32))
    return _fold_bn(gamma, beta, mean, var)


def _reference(x, params):
    """Pure-JAX reference of the same forward pass (same folded weights/thresholds)."""
    w1f, t1, w2f, t2, w3f, t3 = _fold_params(params)
    w1f, w2f, w3f = (w.astype(jnp.float32) for w in (w1f, w2f, w3f))
    y1 = jnp.einsum("nhwc,cd->nhwd", x, w1f)
    sp1 = (y1 >= t1).astype(jnp.float32)
    y2 = lax.conv_general_dilated(sp1, w2f, (1, 1), "SAME",
                                  dimension_numbers=("NHWC", "HWIO", "NHWC"))
    sp2 = (y2 >= t2).astype(jnp.float32)
    y3 = jnp.einsum("nhwc,cd->nhwd", sp2, w3f)
    sp3 = (y3 >= t3).astype(jnp.float32)
    return sp3 + x


if __name__ == "__main__":
    # Bottleneck(inplanes=128, planes=32, expansion=4, base_width=64, groups=1,
    #            stride=1, downsample=None, cnf='ADD'), single-step IF neurons.
    # Cout = 128 keeps the stored channel axis lane-dense (per the perf review).
    inplanes, planes, expansion = 128, 32, 4
    base_width, groups = 64, 1
    width = int(planes * (base_width / 64.0)) * groups          # 32
    cout = planes * expansion                                   # 128 == inplanes
    N, H, W = 2, 16, 16

    key = jax.random.PRNGKey(0)
    keys = jax.random.split(key, 8)

    # binary input spikes, NHWC
    x_nhwc = (jax.random.uniform(keys[0], (N, H, W, inplanes)) < 0.5).astype(jnp.float32)

    w1 = jax.random.normal(keys[1], (inplanes, width), jnp.float32) / jnp.sqrt(float(inplanes))
    w2 = jax.random.normal(keys[2], (3, 3, width, width), jnp.float32) / jnp.sqrt(9.0 * width)
    w3 = jax.random.normal(keys[3], (width, cout), jnp.float32) / jnp.sqrt(float(width))
    s1, b1 = _bn_params(keys[4], width)
    s2, b2 = _bn_params(keys[5], width)
    s3, b3 = _bn_params(keys[6], cout)

    params = dict(w1=w1, s1=s1, b1=b1, w2=w2, s2=s2, b2=b2, w3=w3, s3=s3, b3=b3)

    out = jax.jit(bottleneck_forward)(x_nhwc, params)
    out = jax.block_until_ready(out)

    ref = _reference(x_nhwc, params)
    assert out.shape == (N, H, W, cout)
    assert out.dtype == jnp.bfloat16
    # allow rare binary spike flips at exact-threshold float edges
    mismatch_frac = float(jnp.mean(
        (jnp.abs(out.astype(jnp.float32) - ref) > 1e-3).astype(jnp.float32)))
    assert mismatch_frac < 0.01, f"mismatch fraction too high: {mismatch_frac}"

    print("KERNEL_OK")
</pallas_src>

<mosaic_0001>
module attributes {stable_mosaic.version = 11 : i64} {
  func.func @_bottleneck_kernel(%arg0: i32, %arg1: i32, %arg2: memref<1x16x16x128xbf16, #tpu.memory_space<vmem>>, %arg3: memref<128x32xbf16, #tpu.memory_space<vmem>>, %arg4: memref<1x32xf32, #tpu.memory_space<vmem>>, %arg5: memref<288x32xbf16, #tpu.memory_space<vmem>>, %arg6: memref<1x32xf32, #tpu.memory_space<vmem>>, %arg7: memref<32x128xbf16, #tpu.memory_space<vmem>>, %arg8: memref<1x128xf32, #tpu.memory_space<vmem>>, %arg9: memref<1x8x16x128xbf16, #tpu.memory_space<vmem>>, %arg10: memref<1x18x18x32xbf16, #tpu.memory_space<vmem>>, %arg11: memref<128x288xbf16, #tpu.memory_space<vmem>>) attributes {dimension_semantics = [#tpu.dimension_semantics<parallel>, #tpu.dimension_semantics<arbitrary>], iteration_bounds = array<i64: 2, 2>, scalar_prefetch = 0 : i64, scratch_operands = 2 : i64, tpu.core_type = #tpu.core_type<tc>, window_params = [{transform_indices = @transform_0, window_bounds = array<i64: 1, 16, 16, 128>}, {pipeline_mode = #tpu.pipeline_mode<synchronous>, transform_indices = @transform_1, window_bounds = array<i64: 128, 32>}, {pipeline_mode = #tpu.pipeline_mode<synchronous>, transform_indices = @transform_2, window_bounds = array<i64: 1, 32>}, {pipeline_mode = #tpu.pipeline_mode<synchronous>, transform_indices = @transform_3, window_bounds = array<i64: 288, 32>}, {pipeline_mode = #tpu.pipeline_mode<synchronous>, transform_indices = @transform_4, window_bounds = array<i64: 1, 32>}, {pipeline_mode = #tpu.pipeline_mode<synchronous>, transform_indices = @transform_5, window_bounds = array<i64: 32, 128>}, {pipeline_mode = #tpu.pipeline_mode<synchronous>, transform_indices = @transform_6, window_bounds = array<i64: 1, 128>}, {transform_indices = @transform_7, window_bounds = array<i64: 1, 8, 16, 128>}]} {
    %c0_i32 = arith.constant 0 : i32
    %0 = arith.cmpi eq, %arg1, %c0_i32 : i32
    %1 = arith.extui %0 : i1 to i32
    %c0_i32_0 = arith.constant 0 : i32
    %2 = arith.cmpi ne, %1, %c0_i32_0 : i32
    scf.if %2 {
      %cst_31 = arith.constant 0.000000e+00 : bf16
      %56 = vector.broadcast %cst_31 : bf16 to vector<1x1x18x32xbf16>
      %c0_32 = arith.constant 0 : index
      %c0_33 = arith.constant 0 : index
      %c0_34 = arith.constant 0 : index
      %c0_35 = arith.constant 0 : index
      %57 = vector.load %arg10[%c0_32, %c0_33, %c0_34, %c0_35] : memref<1x18x18x32xbf16, #tpu.memory_space<vmem>>, vector<1x1x18x32xbf16>
      tpu.vector_store %arg10[%c0_32, %c0_33, %c0_34, %c0_35], %56 {strides = array<i32>} : memref<1x18x18x32xbf16, #tpu.memory_space<vmem>>, vector<1x1x18x32xbf16>,
      %cst_36 = arith.constant 0.000000e+00 : bf16
      %58 = vector.broadcast %cst_36 : bf16 to vector<1x1x18x32xbf16>
      %c0_37 = arith.constant 0 : index
      %c17 = arith.constant 17 : index
      %c0_38 = arith.constant 0 : index
      %c0_39 = arith.constant 0 : index
      %59 = vector.load %arg10[%c0_37, %c17, %c0_38, %c0_39] : memref<1x18x18x32xbf16, #tpu.memory_space<vmem>>, vector<1x1x18x32xbf16>
      tpu.vector_store %arg10[%c0_37, %c17, %c0_38, %c0_39], %58 {strides = array<i32>} : memref<1x18x18x32xbf16, #tpu.memory_space<vmem>>, vector<1x1x18x32xbf16>,
      %cst_40 = arith.constant 0.000000e+00 : bf16
      %60 = vector.broadcast %cst_40 : bf16 to vector<1x18x1x32xbf16>
      %c0_41 = arith.constant 0 : index
      %c0_42 = arith.constant 0 : index
      %c0_43 = arith.constant 0 : index
      %c0_44 = arith.constant 0 : index
      %61 = vector.load %arg10[%c0_41, %c0_42, %c0_43, %c0_44] : memref<1x18x18x32xbf16, #tpu.memory_space<vmem>>, vector<1x18x1x32xbf16>
      tpu.vector_store %arg10[%c0_41, %c0_42, %c0_43, %c0_44], %60 {strides = array<i32>} : memref<1x18x18x32xbf16, #tpu.memory_space<vmem>>, vector<1x18x1x32xbf16>,
      %cst_45 = arith.constant 0.000000e+00 : bf16
      %62 = vector.broadcast %cst_45 : bf16 to vector<1x18x1x32xbf16>
      %c0_46 = arith.constant 0 : index
      %c0_47 = arith.constant 0 : index
      %c17_48 = arith.constant 17 : index
      %c0_49 = arith.constant 0 : index
      %63 = vector.load %arg10[%c0_46, %c0_47, %c17_48, %c0_49] : memref<1x18x18x32xbf16, #tpu.memory_space<vmem>>, vector<1x18x1x32xbf16>
      tpu.vector_store %arg10[%c0_46, %c0_47, %c17_48, %c0_49], %62 {strides = array<i32>} : memref<1x18x18x32xbf16, #tpu.memory_space<vmem>>, vector<1x18x1x32xbf16>,
      %c0_50 = arith.constant 0 : index
      %c0_51 = arith.constant 0 : index
      %c0_52 = arith.constant 0 : index
      %c0_53 = arith.constant 0 : index
      %64 = vector.load %arg2[%c0_50, %c0_51, %c0_52, %c0_53] : memref<1x16x16x128xbf16, #tpu.memory_space<vmem>>, vector<1x16x16x128xbf16>
      %65 = vector.shape_cast %64 : vector<1x16x16x128xbf16> to vector<256x128xbf16>
      %c0_54 = arith.constant 0 : index
      %c0_55 = arith.constant 0 : index
      %66 = vector.load %arg3[%c0_54, %c0_55] : memref<128x32xbf16, #tpu.memory_space<vmem>>, vector<128x32xbf16>
      %cst_56 = arith.constant dense<0.000000e+00> : vector<256x32xf32>
      %67 = tpu.matmul %65, %66, %cst_56 {dimension_numbers = #tpu.dot_dimension_numbers<[1], [0], [0], [1], [0, 0, 1, 1], [], []>} : vector<256x128xbf16>, vector<128x32xbf16>, vector<256x32xf32> -> vector<256x32xf32>
      %c0_57 = arith.constant 0 : index
      %c0_58 = arith.constant 0 : index
      %68 = vector.load %arg4[%c0_57, %c0_58] : memref<1x32xf32, #tpu.memory_space<vmem>>, vector<1x32xf32>
      %69 = vector.broadcast %68 : vector<1x32xf32> to vector<256x32xf32>
      %70 = arith.cmpf oge, %67, %69 : vector<256x32xf32>
      %71 = arith.extui %70 : vector<256x32xi1> to vector<256x32xi32>
      %72 = arith.sitofp %71 : vector<256x32xi32> to vector<256x32xf32>
      %73 = arith.truncf %72 : vector<256x32xf32> to vector<256x32xbf16>
      %74 = vector.shape_cast %73 : vector<256x32xbf16> to vector<1x16x16x32xbf16>
      %c0_59 = arith.constant 0 : index
      %c1 = arith.constant 1 : index
      %c1_60 = arith.constant 1 : index
      %c0_61 = arith.constant 0 : index
      %75 = vector.load %arg10[%c0_59, %c1, %c1_60, %c0_61] : memref<1x18x18x32xbf16, #tpu.memory_space<vmem>>, vector<1x16x16x32xbf16>
      tpu.vector_store %arg10[%c0_59, %c1, %c1_60, %c0_61], %74 {strides = array<i32>} : memref<1x18x18x32xbf16, #tpu.memory_space<vmem>>, vector<1x16x16x32xbf16>,
    } else {
    }
    %c8_i32 = arith.constant 8 : i32
    %3 = arith.muli %arg1, %c8_i32 : i32
    %4 = tpu.assume_multiple %3, 8 : i32
    %c0 = arith.constant 0 : index
    %5 = arith.index_cast %4 : i32 to index
    %c0_1 = arith.constant 0 : index
    %c0_2 = arith.constant 0 : index
    %6 = vector.load %arg10[%c0, %5, %c0_1, %c0_2] : memref<1x18x18x32xbf16, #tpu.memory_space<vmem>>, vector<1x10x18x32xbf16>
    %7 = vector.extract_strided_slice %6 {offsets = [0, 0, 0, 0], sizes = [1, 8, 16, 32], strides = [1, 1, 1, 1]} : vector<1x10x18x32xbf16> to vector<1x8x16x32xbf16>
    %8 = vector.shape_cast %7 : vector<1x8x16x32xbf16> to vector<128x32xbf16>
    %c0_3 = arith.constant 0 : index
    %c0_4 = arith.constant 0 : index
    %9 = vector.load %arg11[%c0_3, %c0_4] : memref<128x288xbf16, #tpu.memory_space<vmem>>, vector<128x32xbf16>
    tpu.vector_store %arg11[%c0_3, %c0_4], %8 {strides = array<i32>} : memref<128x288xbf16, #tpu.memory_space<vmem>>, vector<128x32xbf16>,
    %10 = vector.extract_strided_slice %6 {offsets = [0, 0, 1, 0], sizes = [1, 8, 16, 32], strides = [1, 1, 1, 1]} : vector<1x10x18x32xbf16> to vector<1x8x16x32xbf16>
    %11 = vector.shape_cast %10 : vector<1x8x16x32xbf16> to vector<128x32xbf16>
    %c0_5 = arith.constant 0 : index
    %c32 = arith.constant 32 : index
    %12 = vector.load %arg11[%c0_5, %c32] : memref<128x288xbf16, #tpu.memory_space<vmem>>, vector<128x32xbf16>
    tpu.vector_store %arg11[%c0_5, %c32], %11 {strides = array<i32>} : memref<128x288xbf16, #tpu.memory_space<vmem>>, vector<128x32xbf16>,
    %13 = vector.extract_strided_slice %6 {offsets = [0, 0, 2, 0], sizes = [1, 8, 16, 32], strides = [1, 1, 1, 1]} : vector<1x10x18x32xbf16> to vector<1x8x16x32xbf16>
    %14 = vector.shape_cast %13 : vector<1x8x16x32xbf16> to vector<128x32xbf16>
    %c0_6 = arith.constant 0 : index
    %c64 = arith.constant 64 : index
    %15 = vector.load %arg11[%c0_6, %c64] : memref<128x288xbf16, #tpu.memory_space<vmem>>, vector<128x32xbf16>
    tpu.vector_store %arg11[%c0_6, %c64], %14 {strides = array<i32>} : memref<128x288xbf16, #tpu.memory_space<vmem>>, vector<128x32xbf16>,
    %16 = vector.extract_strided_slice %6 {offsets = [0, 1, 0, 0], sizes = [1, 8, 16, 32], strides = [1, 1, 1, 1]} : vector<1x10x18x32xbf16> to vector<1x8x16x32xbf16>
    %17 = vector.shape_cast %16 : vector<1x8x16x32xbf16> to vector<128x32xbf16>
    %c0_7 = arith.constant 0 : index
    %c96 = arith.constant 96 : index
    %18 = vector.load %arg11[%c0_7, %c96] : memref<128x288xbf16, #tpu.memory_space<vmem>>, vector<128x32xbf16>
    tpu.vector_store %arg11[%c0_7, %c96], %17 {strides = array<i32>} : memref<128x288xbf16, #tpu.memory_space<vmem>>, vector<128x32xbf16>,
    %19 = vector.extract_strided_slice %6 {offsets = [0, 1, 1, 0], sizes = [1, 8, 16, 32], strides = [1, 1, 1, 1]} : vector<1x10x18x32xbf16> to vector<1x8x16x32xbf16>
    %20 = vector.shape_cast %19 : vector<1x8x16x32xbf16> to vector<128x32xbf16>
    %c0_8 = arith.constant 0 : index
    %c128 = arith.constant 128 : index
    %21 = vector.load %arg11[%c0_8, %c128] : memref<128x288xbf16, #tpu.memory_space<vmem>>, vector<128x32xbf16>
    tpu.vector_store %arg11[%c0_8, %c128], %20 {strides = array<i32>} : memref<128x288xbf16, #tpu.memory_space<vmem>>, vector<128x32xbf16>,
    %22 = vector.extract_strided_slice %6 {offsets = [0, 1, 2, 0], sizes = [1, 8, 16, 32], strides = [1, 1, 1, 1]} : vector<1x10x18x32xbf16> to vector<1x8x16x32xbf16>
    %23 = vector.shape_cast %22 : vector<1x8x16x32xbf16> to vector<128x32xbf16>
    %c0_9 = arith.constant 0 : index
    %c160 = arith.constant 160 : index
    %24 = vector.load %arg11[%c0_9, %c160] : memref<128x288xbf16, #tpu.memory_space<vmem>>, vector<128x32xbf16>
    tpu.vector_store %arg11[%c0_9, %c160], %23 {strides = array<i32>} : memref<128x288xbf16, #tpu.memory_space<vmem>>, vector<128x32xbf16>,
    %25 = vector.extract_strided_slice %6 {offsets = [0, 2, 0, 0], sizes = [1, 8, 16, 32], strides = [1, 1, 1, 1]} : vector<1x10x18x32xbf16> to vector<1x8x16x32xbf16>
    %26 = vector.shape_cast %25 : vector<1x8x16x32xbf16> to vector<128x32xbf16>
    %c0_10 = arith.constant 0 : index
    %c192 = arith.constant 192 : index
    %27 = vector.load %arg11[%c0_10, %c192] : memref<128x288xbf16, #tpu.memory_space<vmem>>, vector<128x32xbf16>
    tpu.vector_store %arg11[%c0_10, %c192], %26 {strides = array<i32>} : memref<128x288xbf16, #tpu.memory_space<vmem>>, vector<128x32xbf16>,
    %28 = vector.extract_strided_slice %6 {offsets = [0, 2, 1, 0], sizes = [1, 8, 16, 32], strides = [1, 1, 1, 1]} : vector<1x10x18x32xbf16> to vector<1x8x16x32xbf16>
    %29 = vector.shape_cast %28 : vector<1x8x16x32xbf16> to vector<128x32xbf16>
    %c0_11 = arith.constant 0 : index
    %c224 = arith.constant 224 : index
    %30 = vector.load %arg11[%c0_11, %c224] : memref<128x288xbf16, #tpu.memory_space<vmem>>, vector<128x32xbf16>
    tpu.vector_store %arg11[%c0_11, %c224], %29 {strides = array<i32>} : memref<128x288xbf16, #tpu.memory_space<vmem>>, vector<128x32xbf16>,
    %31 = vector.extract_strided_slice %6 {offsets = [0, 2, 2, 0], sizes = [1, 8, 16, 32], strides = [1, 1, 1, 1]} : vector<1x10x18x32xbf16> to vector<1x8x16x32xbf16>
    %32 = vector.shape_cast %31 : vector<1x8x16x32xbf16> to vector<128x32xbf16>
    %c0_12 = arith.constant 0 : index
    %c256 = arith.constant 256 : index
    %33 = vector.load %arg11[%c0_12, %c256] : memref<128x288xbf16, #tpu.memory_space<vmem>>, vector<128x32xbf16>
    tpu.vector_store %arg11[%c0_12, %c256], %32 {strides = array<i32>} : memref<128x288xbf16, #tpu.memory_space<vmem>>, vector<128x32xbf16>,
    %c0_13 = arith.constant 0 : index
    %c0_14 = arith.constant 0 : index
    %34 = vector.load %arg11[%c0_13, %c0_14] : memref<128x288xbf16, #tpu.memory_space<vmem>>, vector<128x288xbf16>
    %c0_15 = arith.constant 0 : index
    %c0_16 = arith.constant 0 : index
    %35 = vector.load %arg5[%c0_15, %c0_16] : memref<288x32xbf16, #tpu.memory_space<vmem>>, vector<288x32xbf16>
    %cst = arith.constant dense<0.000000e+00> : vector<128x32xf32>
    %36 = tpu.matmul %34, %35, %cst {dimension_numbers = #tpu.dot_dimension_numbers<[1], [0], [0], [1], [0, 0, 1, 1], [], []>} : vector<128x288xbf16>, vector<288x32xbf16>, vector<128x32xf32> -> vector<128x32xf32>
    %c0_17 = arith.constant 0 : index
    %c0_18 = arith.constant 0 : index
    %37 = vector.load %arg6[%c0_17, %c0_18] : memref<1x32xf32, #tpu.memory_space<vmem>>, vector<1x32xf32>
    %38 = vector.broadcast %37 : vector<1x32xf32> to vector<128x32xf32>
    %39 = arith.cmpf oge, %36, %38 : vector<128x32xf32>
    %40 = arith.extui %39 : vector<128x32xi1> to vector<128x32xi32>
    %41 = arith.sitofp %40 : vector<128x32xi32> to vector<128x32xf32>
    %42 = arith.truncf %41 : vector<128x32xf32> to vector<128x32xbf16>
    %c0_19 = arith.constant 0 : index
    %c0_20 = arith.constant 0 : index
    %43 = vector.load %arg7[%c0_19, %c0_20] : memref<32x128xbf16, #tpu.memory_space<vmem>>, vector<32x128xbf16>
    %cst_21 = arith.constant dense<0.000000e+00> : vector<128x128xf32>
    %44 = tpu.matmul %42, %43, %cst_21 {dimension_numbers = #tpu.dot_dimension_numbers<[1], [0], [0], [1], [0, 0, 1, 1], [], []>} : vector<128x32xbf16>, vector<32x128xbf16>, vector<128x128xf32> -> vector<128x128xf32>
    %c0_22 = arith.constant 0 : index
    %c0_23 = arith.constant 0 : index
    %45 = vector.load %arg8[%c0_22, %c0_23] : memref<1x128xf32, #tpu.memory_space<vmem>>, vector<1x128xf32>
    %46 = vector.broadcast %45 : vector<1x128xf32> to vector<128x128xf32>
    %47 = arith.cmpf oge, %44, %46 : vector<128x128xf32>
    %48 = arith.extui %47 : vector<128x128xi1> to vector<128x128xi32>
    %49 = arith.sitofp %48 : vector<128x128xi32> to vector<128x128xf32>
    %50 = arith.truncf %49 : vector<128x128xf32> to vector<128x128xbf16>
    %c0_24 = arith.constant 0 : index
    %51 = arith.index_cast %4 : i32 to index
    %c0_25 = arith.constant 0 : index
    %c0_26 = arith.constant 0 : index
    %52 = vector.load %arg2[%c0_24, %51, %c0_25, %c0_26] : memref<1x16x16x128xbf16, #tpu.memory_space<vmem>>, vector<1x8x16x128xbf16>
    %53 = vector.shape_cast %50 : vector<128x128xbf16> to vector<1x8x16x128xbf16>
    %54 = arith.addf %53, %52 : vector<1x8x16x128xbf16>
    %c0_27 = arith.constant 0 : index
    %c0_28 = arith.constant 0 : index
    %c0_29 = arith.constant 0 : index
    %c0_30 = arith.constant 0 : index
    %55 = vector.load %arg9[%c0_27, %c0_28, %c0_29, %c0_30] : memref<1x8x16x128xbf16, #tpu.memory_space<vmem>>, vector<1x8x16x128xbf16>
    tpu.vector_store %arg9[%c0_27, %c0_28, %c0_29, %c0_30], %54 {strides = array<i32>} : memref<1x8x16x128xbf16, #tpu.memory_space<vmem>>, vector<1x8x16x128xbf16>,
    return
  }
  func.func @transform_0(%arg0: i32, %arg1: i32) -> (i32, i32, i32, i32) {
    %c0_i32 = arith.constant 0 : i32
    %c0_i32_0 = arith.constant 0 : i32
    %c0_i32_1 = arith.constant 0 : i32
    %c0_i32_2 = arith.constant 0 : i32
    return %arg0, %c0_i32, %c0_i32_0, %c0_i32_1 : i32, i32, i32, i32
  }
  func.func @transform_1(%arg0: i32, %arg1: i32) -> (i32, i32) {
    %c0_i32 = arith.constant 0 : i32
    %c0_i32_0 = arith.constant 0 : i32
    %c0_i32_1 = arith.constant 0 : i32
    return %c0_i32, %c0_i32_0 : i32, i32
  }
  func.func @transform_2(%arg0: i32, %arg1: i32) -> (i32, i32) {
    %c0_i32 = arith.constant 0 : i32
    %c0_i32_0 = arith.constant 0 : i32
    %c0_i32_1 = arith.constant 0 : i32
    return %c0_i32, %c0_i32_0 : i32, i32
  }
  func.func @transform_3(%arg0: i32, %arg1: i32) -> (i32, i32) {
    %c0_i32 = arith.constant 0 : i32
    %c0_i32_0 = arith.constant 0 : i32
    %c0_i32_1 = arith.constant 0 : i32
    return %c0_i32, %c0_i32_0 : i32, i32
  }
  func.func @transform_4(%arg0: i32, %arg1: i32) -> (i32, i32) {
    %c0_i32 = arith.constant 0 : i32
    %c0_i32_0 = arith.constant 0 : i32
    %c0_i32_1 = arith.constant 0 : i32
    return %c0_i32, %c0_i32_0 : i32, i32
  }
  func.func @transform_5(%arg0: i32, %arg1: i32) -> (i32, i32) {
    %c0_i32 = arith.constant 0 : i32
    %c0_i32_0 = arith.constant 0 : i32
    %c0_i32_1 = arith.constant 0 : i32
    return %c0_i32, %c0_i32_0 : i32, i32
  }
  func.func @transform_6(%arg0: i32, %arg1: i32) -> (i32, i32) {
    %c0_i32 = arith.constant 0 : i32
    %c0_i32_0 = arith.constant 0 : i32
    %c0_i32_1 = arith.constant 0 : i32
    return %c0_i32, %c0_i32_0 : i32, i32
  }
  func.func @transform_7(%arg0: i32, %arg1: i32) -> (i32, i32, i32, i32) {
    %c0_i32 = arith.constant 0 : i32
    %c0_i32_0 = arith.constant 0 : i32
    %c0_i32_1 = arith.constant 0 : i32
    return %arg0, %arg1, %c0_i32, %c0_i32_0 : i32, i32, i32, i32
  }
}

</mosaic_0001>

<bundles_post_ra>
// kernel: bottleneck_forward.1
= control target key start
LH: loop header
LB: loop body
LE: loop exit
PB: predicated region body
PF: predicated region fallthrough
CT: control target
= control target key end

     0   :  { %12 = vsyncpa [#allocation5], 0  ;;  %s5490_s0 = inlined_call_operand.vmem [shape: bf16[2,16,16,128], index: 0, kind: input, shape index: {}]   ;;  %s5491_s1 = inlined_call_operand.vmem [shape: bf16[128,32], index: 1, kind: input, shape index: {}]   ;;  %s5492_s2 = inlined_call_operand.vmem [shape: f32[1,32], index: 2, kind: input, shape index: {}]   ;;  %s5493_s3 = inlined_call_operand.vmem [shape: bf16[288,32], index: 3, kind: input, shape index: {}]   ;;  %s5494_s4 = inlined_call_operand.vmem [shape: f32[1,32], index: 4, kind: input, shape index: {}]   ;;  %s5495_s5 = inlined_call_operand.vmem [shape: bf16[32,128], index: 5, kind: input, shape index: {}]   ;;  %s5496_s6 = inlined_call_operand.vmem [shape: f32[1,128], index: 6, kind: input, shape index: {}]   ;;  %s5497_s7 = inlined_call_operand.hbm [shape: bf16[2,16,16,128], index: 7, kind: output, shape index: {}]  }
   0x1   :  { %14 = vsyncpa [#allocation5 + $0x1], 0  ;;  %s4063_s24 = smov 0   ;;  %s4065_s25 = smov 0  }
   0x2   :  { %s4067_s26 = smov 0   ;;  %s4069_s27 = smov 0  }
   0x3   :  { %s4071_s28 = smov 0   ;;  %s4073_s29 = smov 0  }
   0x4   :  { %s4075_s30 = smov 0   ;;  %s4077_s8 = smov 0  }
   0x5 LB: > { %s3278_s9 = sadd.s32 4294967295, %s4013_s8   ;;  %s3279_s10 = sadd.s32 4294967294, %s4013_s8   ;;  %s4013_s8 = sphi %s4077_s8, %s20_s8   ;;  %s4009_s30 = sphi %s4075_s30, %s5524_s30   ;;  %s4005_s29 = sphi %s4073_s29, %s5523_s29   ;;  %s4001_s28 = sphi %s4071_s28, %s5522_s28   ;;  %s3997_s27 = sphi %s4069_s27, %s5521_s27   ;;  %s3993_s26 = sphi %s4067_s26, %s5520_s26   ;;  %s3989_s25 = sphi %s4065_s25, %s5519_s25   ;;  %s3985_s24 = sphi %s4063_s24, %s5518_s24  }
   0x6   : > { %s29_s11 = sadd.s32 1, %s4005_s29  ;;  %s32_s12 = sadd.s32 1, %s4009_s30 }
   0x7   : > { %p30_p0 = scmp.ge.s32.totalorder %s29_s11, 2  ;;  %p203_p1 = scmp.ne.s32.totalorder %s3993_s26, %s3989_s25 }
   0x8   : > { %p204_p2 = scmp.eq.s32.totalorder %s3278_s9, 3  ;;  %p209_p5 = scmp.ne.s32.totalorder %s3989_s25, %s3985_s24 }
   0x9   : > { %s5526_s11 = smov (%p30_p0, %s29_s11), 0  ;;  %s5528_s12 = smov (!%p30_p0, %s32_s12), %s4009_s30 }
   0xa   : > { %5500 = sst [smem:[#allocation7_spill]] %s5526_s11  ;;  %s189_s13 = ssub.s32 %s4005_s29, %s5526_s11 }
   0xb   : > { %p4114_p3 = por %p204_p2, %p203_p1  ;;  %p34_p4 = scmp.ge.s32.totalorder %s5528_s12, 2 }
   0xc   : > { %p210_p6 = scmp.eq.s32.totalorder %s3279_s10, 3  ;;  %p3282_p7 = scmp.ge.s32.totalorder %s4013_s8, 1 }
   0xd   : > { %s5530_s12 = smov (%p34_p4, %s5528_s12), 0  ;;  %p254_p9 = scmp.lt.s32.totalorder %s4013_s8, 5 }
   0xe   : > { %5502 = sst [smem:[#allocation8_spill]] %s5530_s12  ;;  %p4123_p8 = por %p210_p6, %p209_p5 }
   0xf   : > { %s188_s16 = ssub.s32 %s4009_s30, %s5530_s12  ;;  %s193_s17 = sadd.s32 1, %s3993_s26 }
  0x10   : > { %s190_s18 = sor.u32 %s189_s13, %s188_s16  ;;  %p255_p10 = pnand %p3282_p7, %p254_p9 }
  0x11   : > { %p191_p11 = scmp.eq.s32.totalorder %s190_s18, 0  ;;  %s283_s20 = sand.u32 (!%p255_p10), 1, %s3989_s25  }
  0x12   : > { %258 = sbr.rel (%p255_p10) target bundleno = 1087 (0x43f), region = 48  ;;  %p286_p12 = scmp.lt.s32.totalorder (!%p255_p10), %s4001_s28, 1 }
  0x13   : > { %s4132_s19 = scalar_select %p191_p11, %s3993_s26, %s193_s17  }
  0x14   : > { %s3283_s21 = sshll.u32 (!%p255_p10), %s283_s20, 6  ;;  %p3286_p13 = scmp.ne.s32.totalorder (!%p255_p10), %s3997_s27, 0 }
  0x15   : > { %s4144_s13 = scalar_lea.vmem (!%p255_p10), [#allocation4], %s3283_s21 }
  0x17   : > { %s287_s22 = scalar_select %p286_p12, %s4001_s28, 1 }
  0x18   : > { %296 = sbr.rel (%p3286_p13) target bundleno = 336 (0x150), region = 52 }
  0x19   : > { %s3516_s23 = sshll.u32 %s287_s22, 7 }
  0x1a   : > { %s4142_s12 = scalar_lea.vmem %s5490_s0, %s3516_s23 }
  0x1d   : > { %v3843_v0 = vld [vmem:[%s5491_s1 + $0x38] sm:$0xff]   ;;  %vm297_vm0 = vcmask 257024   ;;  %v3844_v1 = vld [vmem:[%s5491_s1 + $0x30] sm:$0xff]   ;;  %v4015_v2 = vmov 0   ;;  %vm300_vm1 = vcmask 253952   ;;  %v3845_v3 = vld [vmem:[%s5491_s1 + $0x28] sm:$0xff]  }
  0x1e   : > { %3661 = vmatprep.subr.bf16.mxu0 %v3843_v0  ;;  %3749 = vmatprep.subr.bf16.mxu1 %v3843_v0  ;;  %298 = vst.msk [vmem:[#allocation2] sm:$0xf] %vm297_vm0, %v4015_v2  ;;  %299 = vst.msk [vmem:[#allocation2 + $0x4] sm:$0xf] %vm297_vm0, %v4015_v2  ;;  %v3846_v4 = vld [vmem:[%s5491_s1 + $0x20] sm:$0xff]   ;;  %v3847_v7 = vld [vmem:[%s5491_s1 + $0x18] sm:$0xff]  }
  0x1f   : > { %303 = vst.msk [vmem:[#allocation2 + $0xcc] sm:$0xf] %vm297_vm0, %v4015_v2  ;;  %304 = vst.msk [vmem:[#allocation2 + $0xd0] sm:$0xf] %vm297_vm0, %v4015_v2  ;;  %3662 = vmatpush3.bf16.msra.mxu0 %v3843_v0  ;;  %3757 = vmatpush3.bf16.msra.mxu1 %v3843_v0  ;;  %v3851_v5 = vld [vmem:[%s4142_s12] sm:$0xff]   ;;  %v3848_v8 = vld [vmem:[%s5491_s1 + $0x10] sm:$0xff]  }
  0x20   : > { %301 = vst.msk [vmem:[#allocation2 + $0x8] sm:$0x1] %vm300_vm1, %v4015_v2  ;;  %305 = vst.msk [vmem:[#allocation2 + $0xd4] sm:$0x1] %vm300_vm1, %v4015_v2  ;;  %3663 = vmatprep.subr.bf16.mxu0 %v3844_v1  ;;  %3750 = vmatprep.subr.bf16.mxu1 %v3844_v1  ;;  %v3852_v6 = vld [vmem:[%s4142_s12 + $0x40] sm:$0xff]   ;;  %v3849_v9 = vld [vmem:[%s5491_s1 + $0x8] sm:$0xff]  }
  0x21   : > { %3677 = vmatprep.mubr.bf16.mxu0 %v3851_v5  ;;  %3693 = vmatprep.mubr.bf16.mxu1 %v3852_v6  ;;  %v3850_v10 = vld [vmem:[%s5491_s1] sm:$0xff]   ;;  %vm307_vm2 = vsmask.f32 256  ;;  %v315_v12 = vld [vmem:[#allocation2 + $0x18] sm:$0x1]  ;;  %v3853_v23 = vld [vmem:[%s4142_s12 + $0x8] sm:$0xff]  }
  0x22   : > { %vm4181_vm3 = vmand %vm300_vm1, %vm307_vm2  ;;  %vm363_vm4 = vsmask.f32 7938  ;;  %v3854_v24 = vld [vmem:[%s4142_s12 + $0x48] sm:$0xff]   ;;  %v3855_v25 = vld [vmem:[%s4142_s12 + $0x10] sm:$0xff]   ;;  %vm971_vm10 = vsmask.f32 4368 }
  0x23   : > { %3664 = vmatpush3.bf16.msra.mxu0 %v3844_v1  ;;  %3758 = vmatpush3.bf16.msra.mxu1 %v3844_v1  ;;  %v316_v17 = vsel %vm4181_vm3, 0, %v315_v12  ;;  %vm4193_vm5 = vmand %vm300_vm1, %vm363_vm4  ;;  %v3856_v26 = vld [vmem:[%s4142_s12 + $0x50] sm:$0xff]   ;;  %v3857_v27 = vld [vmem:[%s4142_s12 + $0x18] sm:$0xff]  }
  0x24   : > { %3665 = vmatprep.subr.bf16.mxu0 %v3845_v3  ;;  %3751 = vmatprep.subr.bf16.mxu1 %v3845_v3  ;;  %317 = vst [vmem:[#allocation2 + $0x18] sm:$0x1] %v316_v17  ;;  %v3858_v28 = vld [vmem:[%s4142_s12 + $0x58] sm:$0xff]   ;;  %v3859_v29 = vld [vmem:[%s4142_s12 + $0x20] sm:$0xff]   ;;  %v3861_v31 = vld [vmem:[%s4142_s12 + $0x28] sm:$0xff]  }
  0x25   : > { %v309_v11 = vld [vmem:[#allocation2] sm:$0x1]  ;;  %v3862_v32 = vld [vmem:[%s4142_s12 + $0x68] sm:$0xff]   ;;  %v3863_v33 = vld [vmem:[%s4142_s12 + $0x30] sm:$0xff]  }
  0x26   : > { %v360_v14 = vld [vmem:[#allocation2 + $0xcc] sm:$0x1]  ;;  %v310_v16 = vsel %vm4181_vm3, 0, %v309_v11  ;;  %v3860_v30 = vld [vmem:[%s4142_s12 + $0x60] sm:$0xff]   ;;  %v3864_v34 = vld [vmem:[%s4142_s12 + $0x70] sm:$0xff]  }
  0x27   : > { %3666 = vmatpush3.bf16.msra.mxu0 %v3845_v3  ;;  %3759 = vmatpush3.bf16.msra.mxu1 %v3845_v3  ;;  %v365_v15 = vld [vmem:[#allocation2 + $0x8] sm:$0x1]  ;;  %v361_v18 = vsel %vm4181_vm3, 0, %v360_v14  ;;  %v416_v20 = vld [vmem:[#allocation2 + $0xd4] sm:$0x1]  ;;  %v3865_v35 = vld [vmem:[%s4142_s12 + $0x38] sm:$0xff]  }
  0x28   : > { %3667 = vmatprep.subr.bf16.mxu0 %v3846_v4  ;;  %3752 = vmatprep.subr.bf16.mxu1 %v3846_v4  ;;  %311 = vst [vmem:[#allocation2] sm:$0x1] %v310_v16  ;;  %362 = vst [vmem:[#allocation2 + $0xcc] sm:$0x1] %v361_v18  ;;  %v366_v21 = vsel %vm4193_vm5, 0, %v365_v15  ;;  %v417_v22 = vsel %vm4193_vm5, 0, %v416_v20 }
  0x29   : > { %367 = vst [vmem:[#allocation2 + $0x8] sm:$0x1] %v366_v21  ;;  %418 = vst [vmem:[#allocation2 + $0xd4] sm:$0x1] %v417_v22  ;;  %v3866_v36 = vld [vmem:[%s4142_s12 + $0x78] sm:$0xff]  }
  0x2a   : > { %v339_v37 = vld [vmem:[#allocation2 + $0x78] sm:$0x1]  ;;  %v312_v39 = vld [vmem:[#allocation2 + $0xc] sm:$0x1]  ;;  %v371_v43 = vld [vmem:[#allocation2 + $0x20] sm:$0x1] }
  0x2b   : > { %3668 = vmatpush3.bf16.msra.mxu0 %v3846_v4  ;;  %3760 = vmatpush3.bf16.msra.mxu1 %v3846_v4  ;;  %v340_v38 = vsel %vm4181_vm3, 0, %v339_v37  ;;  %v313_v40 = vsel %vm4181_vm3, 0, %v312_v39  ;;  %v336_v41 = vld [vmem:[#allocation2 + $0x6c] sm:$0x1]  ;;  %v372_v44 = vsel %vm4193_vm5, 0, %v371_v43  ;;  %vm4300_vm13 = vmand %vm297_vm0, %vm363_vm4 }
  0x2c   : > { %3669 = vmatprep.subr.bf16.mxu0 %v3847_v7  ;;  %3753 = vmatprep.subr.bf16.mxu1 %v3847_v7  ;;  %341 = vst [vmem:[#allocation2 + $0x78] sm:$0x1] %v340_v38  ;;  %314 = vst [vmem:[#allocation2 + $0xc] sm:$0x1] %v313_v40  ;;  %v337_v42 = vsel %vm4181_vm3, 0, %v336_v41  ;;  %v4016_v40 = vmov 0.0  }
  0x2d   : > { %338 = vst [vmem:[#allocation2 + $0x6c] sm:$0x1] %v337_v42  ;;  %373 = vst [vmem:[#allocation2 + $0x20] sm:$0x1] %v372_v44  ;;  %v395_v45 = vld [vmem:[#allocation2 + $0x80] sm:$0x1] }
  0x2e   : > { %v396_v46 = vsel %vm4193_vm5, 0, %v395_v45  ;;  %v368_v47 = vld [vmem:[#allocation2 + $0x14] sm:$0x1]  ;;  %v321_v51 = vld [vmem:[#allocation2 + $0x30] sm:$0x1]  ;;  %vm4334_vm1 = vmor %vm307_vm2, %vm971_vm10 }
  0x2f   : > { %3670 = vmatpush3.bf16.msra.mxu0 %v3847_v7  ;;  %3761 = vmatpush3.bf16.msra.mxu1 %v3847_v7  ;;  %397 = vst [vmem:[#allocation2 + $0x80] sm:$0x1] %v396_v46  ;;  %v369_v48 = vsel %vm4193_vm5, 0, %v368_v47  ;;  %v392_v49 = vld [vmem:[#allocation2 + $0x74] sm:$0x1]  ;;  %v322_v52 = vsel %vm4181_vm3, 0, %v321_v51 }
  0x30   : > { %3671 = vmatprep.subr.bf16.mxu0 %v3848_v8  ;;  %3754 = vmatprep.subr.bf16.mxu1 %v3848_v8  ;;  %370 = vst [vmem:[#allocation2 + $0x14] sm:$0x1] %v369_v48  ;;  %v393_v50 = vsel %vm4193_vm5, 0, %v392_v49  ;;  %323 = vst [vmem:[#allocation2 + $0x30] sm:$0x1] %v322_v52 }
  0x31   : > { %394 = vst [vmem:[#allocation2 + $0x74] sm:$0x1] %v393_v50  ;;  %v345_v53 = vld [vmem:[#allocation2 + $0x90] sm:$0x1]  ;;  %v318_v55 = vld [vmem:[#allocation2 + $0x24] sm:$0x1] }
  0x32   : > { %v346_v54 = vsel %vm4181_vm3, 0, %v345_v53  ;;  %v319_v56 = vsel %vm4181_vm3, 0, %v318_v55  ;;  %v342_v57 = vld [vmem:[#allocation2 + $0x84] sm:$0x1]  ;;  %v377_v59 = vld [vmem:[#allocation2 + $0x38] sm:$0x1] }
  0x33   : > { %3672 = vmatpush3.bf16.msra.mxu0 %v3848_v8  ;;  %3762 = vmatpush3.bf16.msra.mxu1 %v3848_v8  ;;  %347 = vst [vmem:[#allocation2 + $0x90] sm:$0x1] %v346_v54  ;;  %320 = vst [vmem:[#allocation2 + $0x24] sm:$0x1] %v319_v56  ;;  %v343_v58 = vsel %vm4181_vm3, 0, %v342_v57  ;;  %v378_v60 = vsel %vm4193_vm5, 0, %v377_v59 }
  0x34   : > { %3673 = vmatprep.subr.bf16.mxu0 %v3849_v9  ;;  %3755 = vmatprep.subr.bf16.mxu1 %v3849_v9  ;;  %344 = vst [vmem:[#allocation2 + $0x84] sm:$0x1] %v343_v58  ;;  %379 = vst [vmem:[#allocation2 + $0x38] sm:$0x1] %v378_v60  ;;  %v401_v61 = vld [vmem:[#allocation2 + $0x98] sm:$0x1] }
  0x35   : > { %v402_v62 = vsel %vm4193_vm5, 0, %v401_v61  ;;  %v374_v63 = vld [vmem:[#allocation2 + $0x2c] sm:$0x1]  ;;  %v327_v3 = vld [vmem:[#allocation2 + $0x48] sm:$0x1] }
  0x36   : > { %403 = vst [vmem:[#allocation2 + $0x98] sm:$0x1] %v402_v62  ;;  %v375_v0 = vsel %vm4193_vm5, 0, %v374_v63  ;;  %v398_v1 = vld [vmem:[#allocation2 + $0x8c] sm:$0x1]  ;;  %v328_v4 = vsel %vm4181_vm3, 0, %v327_v3 }
  0x37   : > { %3674 = vmatpush3.bf16.msra.mxu0 %v3849_v9  ;;  %3763 = vmatpush3.bf16.msra.mxu1 %v3849_v9  ;;  %376 = vst [vmem:[#allocation2 + $0x2c] sm:$0x1] %v375_v0  ;;  %v399_v2 = vsel %vm4193_vm5, 0, %v398_v1  ;;  %329 = vst [vmem:[#allocation2 + $0x48] sm:$0x1] %v328_v4 }
  0x38   : > { %3675 = vmatprep.subr.bf16.mxu0 %v3850_v10  ;;  %3756 = vmatprep.subr.bf16.mxu1 %v3850_v10  ;;  %400 = vst [vmem:[#allocation2 + $0x8c] sm:$0x1] %v399_v2  ;;  %v351_v5 = vld [vmem:[#allocation2 + $0xa8] sm:$0x1]  ;;  %v324_v7 = vld [vmem:[#allocation2 + $0x3c] sm:$0x1] }
  0x39   : > { %v352_v6 = vsel %vm4181_vm3, 0, %v351_v5  ;;  %v325_v8 = vsel %vm4181_vm3, 0, %v324_v7  ;;  %v348_v9 = vld [vmem:[#allocation2 + $0x9c] sm:$0x1]  ;;  %v383_v11 = vld [vmem:[#allocation2 + $0x50] sm:$0x1] }
  0x3a   : > { %353 = vst [vmem:[#allocation2 + $0xa8] sm:$0x1] %v352_v6  ;;  %326 = vst [vmem:[#allocation2 + $0x3c] sm:$0x1] %v325_v8  ;;  %v407_v12 = vld [vmem:[#allocation2 + $0xb0] sm:$0x1] }
  0x3b   : > { %3676 = vmatpush3.bf16.msra.mxu0 %v3850_v10  ;;  %3764 = vmatpush3.bf16.msra.mxu1 %v3850_v10  ;;  %v349_v10 = vsel %vm4181_vm3, 0, %v348_v9  ;;  %v384_v14 = vsel %vm4193_vm5, 0, %v383_v11  ;;  %v408_v15 = vsel %vm4193_vm5, 0, %v407_v12  ;;  %v380_v16 = vld [vmem:[#allocation2 + $0x44] sm:$0x1] }
  0x3c   : > { %350 = vst [vmem:[#allocation2 + $0x9c] sm:$0x1] %v349_v10  ;;  %385 = vst [vmem:[#allocation2 + $0x50] sm:$0x1] %v384_v14  ;;  %v381_v17 = vsel %vm4193_vm5, 0, %v380_v16 }
  0x3d   : > { %409 = vst [vmem:[#allocation2 + $0xb0] sm:$0x1] %v408_v15  ;;  %382 = vst [vmem:[#allocation2 + $0x44] sm:$0x1] %v381_v17  ;;  %v404_v18 = vld [vmem:[#allocation2 + $0xa4] sm:$0x1] }
  0x3e   : > { %3678 = vmatmul.mubr.bf16.vlgmr.msra.gmra.mxu0 %v3853_v23  ;;  %3694 = vmatmul.mubr.bf16.vlgmr.msra.gmra.mxu1 %v3854_v24  ;;  %v405_v20 = vsel %vm4193_vm5, 0, %v404_v18  ;;  %v333_v21 = vld [vmem:[#allocation2 + $0x60] sm:$0x1]  ;;  %v1303_v59 = vld [vmem:[#allocation2 + $0x18] sm:$0xf] }
  0x3f   : > { %3681 = vmatprep.mubr.bf16.mxu0 %v3855_v25  ;;  %3697 = vmatprep.mubr.bf16.mxu1 %v3856_v26  ;;  %406 = vst [vmem:[#allocation2 + $0xa4] sm:$0x1] %v405_v20  ;;  %v334_v22 = vsel %vm4181_vm3, 0, %v333_v21  ;;  %v357_v23 = vld [vmem:[#allocation2 + $0xc0] sm:$0x1] }
  0x40   : > { %335 = vst [vmem:[#allocation2 + $0x60] sm:$0x1] %v334_v22  ;;  %v358_v24 = vsel %vm4181_vm3, 0, %v357_v23  ;;  %v330_v25 = vld [vmem:[#allocation2 + $0x54] sm:$0x1] }
  0x41   : > { %359 = vst [vmem:[#allocation2 + $0xc0] sm:$0x1] %v358_v24  ;;  %v331_v26 = vsel %vm4181_vm3, 0, %v330_v25  ;;  %v4280_v37 = vld [vmem:[%s5492_s2] ss:$0 sm:$0xff] }
  0x42   : > { %332 = vst [vmem:[#allocation2 + $0x54] sm:$0x1] %v331_v26  ;;  %v1359_v0 = vld [vmem:[#allocation2 + $0x78] sm:$0xf]  ;;  %v1296_v18 = vld [vmem:[#allocation2 + $0xc] sm:$0xf] }
  0x43   : > { %v1352_v20 = vld [vmem:[#allocation2 + $0x6c] sm:$0xf] }
  0x46   : > { %3682 = vmatmul.mubr.bf16.gmra.mxu0 %v3857_v27  ;;  %3698 = vmatmul.mubr.bf16.gmra.mxu1 %v3858_v28  ;;  %v354_v27 = vld [vmem:[#allocation2 + $0xb4] sm:$0x1] }
  0x47   : > { %3685 = vmatprep.mubr.bf16.mxu0 %v3859_v29  ;;  %3701 = vmatprep.mubr.bf16.mxu1 %v3860_v30  ;;  %v355_v28 = vsel %vm4181_vm3, 0, %v354_v27  ;;  %v389_v29 = vld [vmem:[#allocation2 + $0x68] sm:$0x1] }
  0x48   : > { %356 = vst [vmem:[#allocation2 + $0xb4] sm:$0x1] %v355_v28  ;;  %v390_v30 = vsel %vm4193_vm5, 0, %v389_v29 }
  0x49   : > { %391 = vst [vmem:[#allocation2 + $0x68] sm:$0x1] %v390_v30 }
  0x4e   : > { %3686 = vmatmul.mubr.bf16.gmra.mxu0 %v3861_v31  ;;  %3702 = vmatmul.mubr.bf16.gmra.mxu1 %v3862_v32  ;;  %v413_v31 = vld [vmem:[#allocation2 + $0xc8] sm:$0x1] }
  0x4f   : > { %3689 = vmatprep.mubr.bf16.mxu0 %v3863_v33  ;;  %3705 = vmatprep.mubr.bf16.mxu1 %v3864_v34  ;;  %v414_v32 = vsel %vm4193_vm5, 0, %v413_v31  ;;  %v386_v33 = vld [vmem:[#allocation2 + $0x5c] sm:$0x1] }
  0x50   : > { %415 = vst [vmem:[#allocation2 + $0xc8] sm:$0x1] %v414_v32  ;;  %v387_v34 = vsel %vm4193_vm5, 0, %v386_v33 }
  0x51   : > { %388 = vst [vmem:[#allocation2 + $0x5c] sm:$0x1] %v387_v34 }
  0x56   : > { %3690 = vmatmul.mubr.bf16.gmra.mxu0 %v3865_v35  ;;  %3706 = vmatmul.mubr.bf16.gmra.mxu1 %v3866_v36  ;;  %v410_v35 = vld [vmem:[#allocation2 + $0xbc] sm:$0x1] }
  0x57   : > { %v411_v36 = vsel %vm4193_vm5, 0, %v410_v35 }
  0x58   : > { %412 = vst [vmem:[#allocation2 + $0xbc] sm:$0x1] %v411_v36 }
  0xfe   : > { %v3679_v38 = vpop.f32.mrf.mxu0  ;;  %v3695_v39 = vpop.f32.mrf.mxu1 }
  0xff   : > { %vm781_vm6 = vcmp.ge.f32.partialorder %v3679_v38, %v4280_v37  ;;  %vm797_vm7 = vcmp.ge.f32.partialorder %v3695_v39, %v4280_v37 }
 0x100   : > { %v3314_v41 = vsel %vm781_vm6, 1.0, %v4016_v40  ;;  %v3330_v42 = vsel %vm797_vm7, 1.0, %v4016_v40  ;;  %v645_v43 = vpop.f32.mrf.mxu0  ;;  %v709_v19 = vpop.f32.mrf.mxu1 }
 0x101   : > { %v3519_v44 = vpack.c.bf16 %v3314_v41, %v3314_v41  ;;  %v3535_v45 = vpack.c.bf16 %v3330_v42, %v3330_v42  ;;  %vm779_vm8 = vcmp.ge.f32.partialorder %v645_v43, %v4280_v37  ;;  %vm795_vm9 = vcmp.ge.f32.partialorder %v709_v19, %v4280_v37  ;;  %v1307_v42 = vld [vmem:[#allocation2 + $0x20] sm:$0x1] }
 0x102   : > { %v3312_v46 = vsel %vm779_vm8, 1.0, %v4016_v40  ;;  %v3328_v47 = vsel %vm795_vm9, 1.0, %v4016_v40  ;;  %v3680_v48 = vpop.f32.mrf.mxu0  ;;  %v3696_v49 = vpop.f32.mrf.mxu1  ;;  %v1363_v43 = vld [vmem:[#allocation2 + $0x80] sm:$0x1] }
 0x103   : > { %v991_v50 = vshrl.u32 %v3519_v44, 16  ;;  %v994_v51 = vshll.u32 %v3519_v44, 16  ;;  %v1127_v52 = vshrl.u32 %v3535_v45, 16  ;;  %v1130_v53 = vshll.u32 %v3535_v45, 16 }
 0x104   : > { %v3517_v54 = vpack.c.bf16 %v3312_v46, %v3312_v46  ;;  %v3533_v55 = vpack.c.bf16 %v3328_v47, %v3328_v47  ;;  %vm782_vm11 = vcmp.ge.f32.partialorder %v3680_v48, %v4280_v37  ;;  %vm798_vm12 = vcmp.ge.f32.partialorder %v3696_v49, %v4280_v37  ;;  %v648_v56 = vpop.f32.mrf.mxu0  ;;  %v712_v57 = vpop.f32.mrf.mxu1 }
 0x105   : > { %v4292_v58 = vrot.slane %v991_v50, 7  ;;  %v4294_v60 = vrot.slane %v1127_v52, 7  ;;  %v3315_v61 = vsel %vm782_vm11, 1.0, %v4016_v40  ;;  %v3331_v62 = vsel %vm798_vm12, 1.0, %v4016_v40 }
 0x106   : > { %v974_v1 = vshrl.u32 %v3517_v54, 16  ;;  %v977_v2 = vshll.u32 %v3517_v54, 16  ;;  %v1110_v3 = vshrl.u32 %v3533_v55, 16  ;;  %v1113_v4 = vshll.u32 %v3533_v55, 16  ;;  %v3683_v9 = vpop.f32.mrf.mxu0  ;;  %v3699_v10 = vpop.f32.mrf.mxu1 }
 0x107   : > { %v996_v5 = vor.u32 %v994_v51, %v4292_v58  ;;  %v997_v6 = vrot.slane %v4292_v58, 4  ;;  %v1132_v7 = vor.u32 %v1130_v53, %v4294_v60  ;;  %v1133_v8 = vrot.slane %v4294_v60, 4 }
 0x108   : > { %v4308_v11 = vrot.slane %v974_v1, 7  ;;  %v4310_v12 = vrot.slane %v1110_v3, 7  ;;  %v3520_v14 = vpack.c.bf16 %v3315_v61, %v3315_v61  ;;  %v3536_v15 = vpack.c.bf16 %v3331_v62, %v3331_v62  ;;  %v661_v29 = vpop.f32.mrf.mxu0  ;;  %v725_v30 = vpop.f32.mrf.mxu1  ;;  %v1300_v61 = vld [vmem:[#allocation2 + $0x14] sm:$0x1] }
 0x109   : > { %v1304_v16 = vsel %vm4300_vm13, %v996_v5, %v1303_v59  ;;  %v1360_v17 = vsel %vm4300_vm13, %v1132_v7, %v1359_v0  ;;  %vm780_vm14 = vcmp.ge.f32.partialorder %v648_v56, %v4280_v37  ;;  %vm796_vm15 = vcmp.ge.f32.partialorder %v712_v57, %v4280_v37  ;;  %v1356_v62 = vld [vmem:[#allocation2 + $0x74] sm:$0x1] }
 0x10a   : > { %1305 = vst [vmem:[#allocation2 + $0x18] sm:$0xf] %v1304_v16  ;;  %1361 = vst [vmem:[#allocation2 + $0x78] sm:$0xf] %v1360_v17  ;;  %v979_v21 = vor.u32 %v977_v2, %v4308_v11  ;;  %v980_v22 = vrot.slane %v4308_v11, 4  ;;  %v1115_v23 = vor.u32 %v1113_v4, %v4310_v12  ;;  %v1116_v24 = vrot.slane %v4310_v12, 4  ;;  %v3684_v55 = vpop.f32.mrf.mxu0  ;;  %v3700_v56 = vpop.f32.mrf.mxu1 }
 0x10b   : > { %v999_v25 = vshrl.u32 %v3520_v14, 16  ;;  %v1002_v26 = vshll.u32 %v3520_v14, 16  ;;  %v1135_v27 = vshrl.u32 %v3536_v15, 16  ;;  %v1138_v28 = vshll.u32 %v3536_v15, 16  ;;  %v1373_v12 = vld [vmem:[#allocation2 + $0x90] sm:$0xf] }
 0x10c   : > { %v1297_v31 = vsel %vm4300_vm13, %v979_v21, %v1296_v18  ;;  %v1353_v32 = vsel %vm4300_vm13, %v1115_v23, %v1352_v20  ;;  %v3313_v33 = vsel %vm780_vm14, 1.0, %v4016_v40  ;;  %v3329_v34 = vsel %vm796_vm15, 1.0, %v4016_v40  ;;  %v664_v15 = vpop.f32.mrf.mxu0  ;;  %v728_v16 = vpop.f32.mrf.mxu1 }
 0x10d   : > { %1298 = vst [vmem:[#allocation2 + $0xc] sm:$0xf] %v1297_v31  ;;  %1354 = vst [vmem:[#allocation2 + $0x6c] sm:$0xf] %v1353_v32  ;;  %v1001_v35 = vrot.slane %v999_v25, 7  ;;  %v1137_v36 = vrot.slane %v1135_v27, 7  ;;  %v3518_v38 = vpack.c.bf16 %v3313_v33, %v3313_v33  ;;  %v3534_v39 = vpack.c.bf16 %v3329_v34, %v3329_v34 }
 0x10e   : > { %vm785_vm4 = vcmp.ge.f32.partialorder %v3683_v9, %v4280_v37  ;;  %vm801_vm5 = vcmp.ge.f32.partialorder %v3699_v10, %v4280_v37  ;;  %vm783_vm6 = vcmp.ge.f32.partialorder %v661_v29, %v4280_v37  ;;  %vm799_vm7 = vcmp.ge.f32.partialorder %v725_v30, %v4280_v37  ;;  %v3687_v34 = vpop.f32.mrf.mxu0 }
 0x10f   : > { %v1004_v19 = vor.u32 %v1002_v26, %v1001_v35  ;;  %v1006_v44 = vrot.slane %v1001_v35, 4  ;;  %v1140_v45 = vor.u32 %v1138_v28, %v1137_v36  ;;  %v1142_v46 = vrot.slane %v1137_v36, 4  ;;  %v1317_v26 = vld [vmem:[#allocation2 + $0x30] sm:$0xf]  ;;  %v3703_v35 = vpop.f32.mrf.mxu1 }
 0x110   : > { %v982_v47 = vshrl.u32 %v3518_v38, 16  ;;  %v985_v48 = vshll.u32 %v3518_v38, 16  ;;  %v1118_v49 = vshrl.u32 %v3534_v39, 16  ;;  %v1121_v50 = vshll.u32 %v3534_v39, 16 }
 0x111   : > { %v1005_v51 = vsel %vm4334_vm1, %v997_v6, %v1004_v19  ;;  %v1308_v52 = vsel %vm4181_vm3, %v1006_v44, %v1307_v42  ;;  %v1141_v53 = vsel %vm4334_vm1, %v1133_v8, %v1140_v45  ;;  %v1364_v54 = vsel %vm4181_vm3, %v1142_v46, %v1363_v43  ;;  %v1310_v46 = vld [vmem:[#allocation2 + $0x24] sm:$0xf] }
 0x112   : > { %1306 = vst.msk [vmem:[#allocation2 + $0x1c] sm:$0xf] %vm297_vm0, %v1005_v51  ;;  %1309 = vst [vmem:[#allocation2 + $0x20] sm:$0x1] %v1308_v52  ;;  %v984_v57 = vrot.slane %v982_v47, 7  ;;  %v1120_v58 = vrot.slane %v1118_v49, 7  ;;  %vm786_vm2 = vcmp.ge.f32.partialorder %v3684_v55, %v4280_v37  ;;  %vm802_vm8 = vcmp.ge.f32.partialorder %v3700_v56, %v4280_v37 }
 0x113   : > { %1362 = vst.msk [vmem:[#allocation2 + $0x7c] sm:$0xf] %vm297_vm0, %v1141_v53  ;;  %1365 = vst [vmem:[#allocation2 + $0x80] sm:$0x1] %v1364_v54  ;;  %v3318_v59 = vsel %vm785_vm4, 1.0, %v4016_v40  ;;  %v3334_v60 = vsel %vm801_vm5, 1.0, %v4016_v40  ;;  %vm784_vm9 = vcmp.ge.f32.partialorder %v664_v15, %v4280_v37  ;;  %vm800_vm10 = vcmp.ge.f32.partialorder %v728_v16, %v4280_v37  ;;  %v677_v16 = vpop.f32.mrf.mxu0 }
 0x114   : > { %v3523_v0 = vpack.c.bf16 %v3318_v59, %v3318_v59  ;;  %v3539_v1 = vpack.c.bf16 %v3334_v60, %v3334_v60  ;;  %v3316_v2 = vsel %vm783_vm6, 1.0, %v4016_v40  ;;  %v3332_v3 = vsel %vm799_vm7, 1.0, %v4016_v40  ;;  %v1366_v47 = vld [vmem:[#allocation2 + $0x84] sm:$0xf] }
 0x115   : > { %v987_v4 = vor.u32 %v985_v48, %v984_v57  ;;  %v989_v5 = vrot.slane %v984_v57, 4  ;;  %v1123_v6 = vor.u32 %v1121_v50, %v1120_v58  ;;  %v1125_v7 = vrot.slane %v1120_v58, 4 }
 0x116   : > { %v1025_v8 = vshrl.u32 %v3523_v0, 16  ;;  %v1028_v9 = vshll.u32 %v3523_v0, 16  ;;  %v1161_v10 = vshrl.u32 %v3539_v1, 16  ;;  %v1164_v14 = vshll.u32 %v3539_v1, 16  ;;  %v1321_v0 = vld [vmem:[#allocation2 + $0x38] sm:$0x1] }
 0x117   : > { %v988_v17 = vsel %vm4334_vm1, %v980_v22, %v987_v4  ;;  %v1301_v18 = vsel %vm4181_vm3, %v989_v5, %v1300_v61  ;;  %v1124_v20 = vsel %vm4334_vm1, %v1116_v24, %v1123_v6  ;;  %v1357_v21 = vsel %vm4181_vm3, %v1125_v7, %v1356_v62  ;;  %v1377_v4 = vld [vmem:[#allocation2 + $0x98] sm:$0x1] }
 0x118   : > { %1299 = vst.msk [vmem:[#allocation2 + $0x10] sm:$0xf] %vm297_vm0, %v988_v17  ;;  %1302 = vst [vmem:[#allocation2 + $0x14] sm:$0x1] %v1301_v18  ;;  %v4378_v11 = vrot.slane %v1025_v8, 7  ;;  %v4380_v22 = vrot.slane %v1161_v10, 7  ;;  %v3521_v23 = vpack.c.bf16 %v3316_v2, %v3316_v2  ;;  %v3537_v25 = vpack.c.bf16 %v3332_v3, %v3332_v3  ;;  %v741_v17 = vpop.f32.mrf.mxu1 }
 0x119   : > { %1355 = vst.msk [vmem:[#allocation2 + $0x70] sm:$0xf] %vm297_vm0, %v1124_v20  ;;  %1358 = vst [vmem:[#allocation2 + $0x74] sm:$0x1] %v1357_v21  ;;  %v3319_v39 = vsel %vm786_vm2, 1.0, %v4016_v40  ;;  %v3335_v42 = vsel %vm802_vm8, 1.0, %v4016_v40  ;;  %vm789_vm11 = vcmp.ge.f32.partialorder %v3687_v34, %v4280_v37  ;;  %vm805_vm12 = vcmp.ge.f32.partialorder %v3703_v35, %v4280_v37 }
 0x11a   : > { %v1030_v24 = vor.u32 %v1028_v9, %v4378_v11  ;;  %v1031_v27 = vrot.slane %v4378_v11, 4  ;;  %v1166_v28 = vor.u32 %v1164_v14, %v4380_v22  ;;  %v1167_v29 = vrot.slane %v4380_v22, 4 }
 0x11b   : > { %v1008_v30 = vshrl.u32 %v3521_v23, 16  ;;  %v1011_v31 = vshll.u32 %v3521_v23, 16  ;;  %v1144_v32 = vshrl.u32 %v3537_v25, 16  ;;  %v1147_v33 = vshll.u32 %v3537_v25, 16 }
 0x11c   : > { %v1318_v36 = vsel %vm4300_vm13, %v1030_v24, %v1317_v26  ;;  %v1374_v38 = vsel %vm4300_vm13, %v1166_v28, %v1373_v12  ;;  %v3524_v44 = vpack.c.bf16 %v3319_v39, %v3319_v39  ;;  %v3540_v45 = vpack.c.bf16 %v3335_v42, %v3335_v42  ;;  %v1314_v12 = vld [vmem:[#allocation2 + $0x2c] sm:$0x1] }
 0x11d   : > { %1319 = vst [vmem:[#allocation2 + $0x30] sm:$0xf] %v1318_v36  ;;  %1375 = vst [vmem:[#allocation2 + $0x90] sm:$0xf] %v1374_v38  ;;  %v4400_v43 = vrot.slane %v1008_v30, 7  ;;  %v4402_v19 = vrot.slane %v1144_v32, 7  ;;  %v3704_v36 = vpop.f32.mrf.mxu1  ;;  %vm787_vm14 = vcmp.ge.f32.partialorder %v677_v16, %v4280_v37  ;;  %vm803_vm15 = vcmp.ge.f32.partialorder %v741_v17, %v4280_v37 }
 0x11e   : > { %v3317_v48 = vsel %vm784_vm9, 1.0, %v4016_v40  ;;  %v3333_v49 = vsel %vm800_vm10, 1.0, %v4016_v40  ;;  %v1033_v54 = vshrl.u32 %v3524_v44, 16  ;;  %v1036_v55 = vshll.u32 %v3524_v44, 16  ;;  %v1370_v24 = vld [vmem:[#allocation2 + $0x8c] sm:$0x1] }
 0x11f   : > { %v1013_v50 = vor.u32 %v1011_v31, %v4400_v43  ;;  %v1014_v51 = vrot.slane %v4400_v43, 4  ;;  %v1149_v52 = vor.u32 %v1147_v33, %v4402_v19  ;;  %v1150_v53 = vrot.slane %v4402_v19, 4  ;;  %v1380_v16 = vld [vmem:[#allocation2 + $0x9c] sm:$0xf] }
 0x120   : > { %v1169_v56 = vshrl.u32 %v3540_v45, 16  ;;  %v1172_v57 = vshll.u32 %v3540_v45, 16  ;;  %v3522_v60 = vpack.c.bf16 %v3317_v48, %v3317_v48  ;;  %v3538_v61 = vpack.c.bf16 %v3333_v49, %v3333_v49  ;;  %v1331_v45 = vld [vmem:[#allocation2 + $0x48] sm:$0xf] }
 0x121   : > { %v1311_v58 = vsel %vm4300_vm13, %v1013_v50, %v1310_v46  ;;  %v1367_v59 = vsel %vm4300_vm13, %v1149_v52, %v1366_v47  ;;  %v1035_v62 = vrot.slane %v1033_v54, 7  ;;  %v3322_v2 = vsel %vm789_vm11, 1.0, %v4016_v40  ;;  %v1387_v46 = vld [vmem:[#allocation2 + $0xa8] sm:$0xf] }
 0x122   : > { %1312 = vst [vmem:[#allocation2 + $0x24] sm:$0xf] %v1311_v58  ;;  %1368 = vst [vmem:[#allocation2 + $0x84] sm:$0xf] %v1367_v59  ;;  %v1171_v1 = vrot.slane %v1169_v56, 7  ;;  %v3338_v3 = vsel %vm805_vm12, 1.0, %v4016_v40  ;;  %v3527_v21 = vpack.c.bf16 %v3322_v2, %v3322_v2  ;;  %vm806_vm5 = vcmp.ge.f32.partialorder %v3704_v36, %v4280_v37  ;;  %v744_v58 = vpop.f32.mrf.mxu1 }
 0x123   : > { %v1016_v5 = vshrl.u32 %v3522_v60, 16  ;;  %v1019_v6 = vshll.u32 %v3522_v60, 16  ;;  %v1152_v7 = vshrl.u32 %v3538_v61, 16  ;;  %v1155_v8 = vshll.u32 %v3538_v61, 16 }
 0x124   : > { %v1038_v9 = vor.u32 %v1036_v55, %v1035_v62  ;;  %v1040_v10 = vrot.slane %v1035_v62, 4  ;;  %v1174_v14 = vor.u32 %v1172_v57, %v1171_v1  ;;  %v1176_v15 = vrot.slane %v1171_v1, 4 }
 0x125   : > { %v1018_v18 = vrot.slane %v1016_v5, 7  ;;  %v1154_v20 = vrot.slane %v1152_v7, 7  ;;  %v3543_v11 = vpack.c.bf16 %v3338_v3, %v3338_v3  ;;  %v1059_v32 = vshrl.u32 %v3527_v21, 16 }
 0x126   : > { %v1039_v22 = vsel %vm4334_vm1, %v1031_v27, %v1038_v9  ;;  %v1322_v23 = vsel %vm4181_vm3, %v1040_v10, %v1321_v0  ;;  %v1175_v25 = vsel %vm4334_vm1, %v1167_v29, %v1174_v14  ;;  %v1378_v26 = vsel %vm4181_vm3, %v1176_v15, %v1377_v4  ;;  %v3688_v29 = vpop.f32.mrf.mxu0  ;;  %v1324_v9 = vld [vmem:[#allocation2 + $0x3c] sm:$0xf]  ;;  %v3707_v15 = vpop.f32.mrf.mxu1 }
 0x127   : > { %1320 = vst.msk [vmem:[#allocation2 + $0x34] sm:$0xf] %vm297_vm0, %v1039_v22  ;;  %1323 = vst [vmem:[#allocation2 + $0x38] sm:$0x1] %v1322_v23  ;;  %v1021_v28 = vor.u32 %v1019_v6, %v1018_v18  ;;  %v1023_v30 = vrot.slane %v1018_v18, 4  ;;  %v1157_v27 = vor.u32 %v1155_v8, %v1154_v20  ;;  %v1159_v31 = vrot.slane %v1154_v20, 4 }
 0x128   : > { %1376 = vst.msk [vmem:[#allocation2 + $0x94] sm:$0xf] %vm297_vm0, %v1175_v25  ;;  %1379 = vst [vmem:[#allocation2 + $0x98] sm:$0x1] %v1378_v26  ;;  %v1062_v33 = vshll.u32 %v3527_v21, 16  ;;  %v1195_v34 = vshrl.u32 %v3543_v11, 16  ;;  %vm790_vm4 = vcmp.ge.f32.partialorder %v3688_v29, %v4280_v37  ;;  %v680_v57 = vpop.f32.mrf.mxu0  ;;  %vm804_vm7 = vcmp.ge.f32.partialorder %v744_v58, %v4280_v37  ;;  %v757_v29 = vpop.f32.mrf.mxu1 }
 0x129   : > { %v1198_v35 = vshll.u32 %v3543_v11, 16  ;;  %v1022_v38 = vsel %vm4334_vm1, %v1014_v51, %v1021_v28  ;;  %v1315_v39 = vsel %vm4181_vm3, %v1023_v30, %v1314_v12  ;;  %v1158_v42 = vsel %vm4334_vm1, %v1150_v53, %v1157_v27  ;;  %v1335_v26 = vld [vmem:[#allocation2 + $0x50] sm:$0x1] }
 0x12a   : > { %v1371_v43 = vsel %vm4181_vm3, %v1159_v31, %v1370_v24  ;;  %1313 = vst.msk [vmem:[#allocation2 + $0x28] sm:$0xf] %vm297_vm0, %v1022_v38  ;;  %1316 = vst [vmem:[#allocation2 + $0x2c] sm:$0x1] %v1315_v39  ;;  %v4446_v19 = vrot.slane %v1059_v32, 7  ;;  %v4448_v44 = vrot.slane %v1195_v34, 7  ;;  %vm788_vm6 = vcmp.ge.f32.partialorder %v680_v57, %v4280_v37  ;;  %v3691_v14 = vpop.f32.mrf.mxu0 }
 0x12b   : > { %1369 = vst.msk [vmem:[#allocation2 + $0x88] sm:$0xf] %vm297_vm0, %v1158_v42  ;;  %1372 = vst [vmem:[#allocation2 + $0x8c] sm:$0x1] %v1371_v43  ;;  %v3320_v47 = vsel %vm787_vm14, 1.0, %v4016_v40  ;;  %v3336_v48 = vsel %vm803_vm15, 1.0, %v4016_v40  ;;  %vm793_vm2 = vcmp.ge.f32.partialorder %v3691_v14, %v4280_v37  ;;  %vm809_vm8 = vcmp.ge.f32.partialorder %v3707_v15, %v4280_v37 }
 0x12c   : > { %v1064_v49 = vor.u32 %v1062_v33, %v4446_v19  ;;  %v1065_v50 = vrot.slane %v4446_v19, 4  ;;  %v1200_v51 = vor.u32 %v1198_v35, %v4448_v44  ;;  %v1201_v52 = vrot.slane %v4448_v44, 4  ;;  %v1391_v12 = vld [vmem:[#allocation2 + $0xb0] sm:$0x1]  ;;  %v693_v35 = vpop.f32.mrf.mxu0 }
 0x12d   : > { %v3525_v53 = vpack.c.bf16 %v3320_v47, %v3320_v47  ;;  %v3541_v54 = vpack.c.bf16 %v3336_v48, %v3336_v48  ;;  %v3323_v55 = vsel %vm790_vm4, 1.0, %v4016_v40  ;;  %v3339_v56 = vsel %vm806_vm5, 1.0, %v4016_v40 }
 0x12e   : > { %v1332_v59 = vsel %vm4300_vm13, %v1064_v49, %v1331_v45  ;;  %v1388_v60 = vsel %vm4300_vm13, %v1200_v51, %v1387_v46  ;;  %v3528_v61 = vpack.c.bf16 %v3323_v55, %v3323_v55  ;;  %v3544_v62 = vpack.c.bf16 %v3339_v56, %v3339_v56  ;;  %v3708_v51 = vpop.f32.mrf.mxu1 }
 0x12f   : > { %1333 = vst [vmem:[#allocation2 + $0x48] sm:$0xf] %v1332_v59  ;;  %1389 = vst [vmem:[#allocation2 + $0xa8] sm:$0xf] %v1388_v60  ;;  %v1042_v0 = vshrl.u32 %v3525_v53, 16  ;;  %v1045_v1 = vshll.u32 %v3525_v53, 16  ;;  %vm791_vm9 = vcmp.ge.f32.partialorder %v693_v35, %v4280_v37  ;;  %vm807_vm10 = vcmp.ge.f32.partialorder %v757_v29, %v4280_v37 }
 0x130   : > { %v1178_v2 = vshrl.u32 %v3541_v54, 16  ;;  %v1181_v3 = vshll.u32 %v3541_v54, 16  ;;  %v1067_v4 = vshrl.u32 %v3528_v61, 16  ;;  %v1070_v5 = vshll.u32 %v3528_v61, 16  ;;  %v1384_v53 = vld [vmem:[#allocation2 + $0xa4] sm:$0x1] }
 0x131   : > { %v1203_v6 = vshrl.u32 %v3544_v62, 16  ;;  %v1206_v7 = vshll.u32 %v3544_v62, 16  ;;  %v4466_v8 = vrot.slane %v1042_v0, 7  ;;  %v3321_v20 = vsel %vm788_vm6, 1.0, %v4016_v40 }
 0x132   : > { %v4468_v10 = vrot.slane %v1178_v2, 7  ;;  %v1069_v17 = vrot.slane %v1067_v4, 7  ;;  %v3337_v21 = vsel %vm804_vm7, 1.0, %v4016_v40  ;;  %v3526_v33 = vpack.c.bf16 %v3321_v20, %v3321_v20 }
 0x133   : > { %v1205_v18 = vrot.slane %v1203_v6, 7  ;;  %v1047_v11 = vor.u32 %v1045_v1, %v4466_v8  ;;  %v1048_v22 = vrot.slane %v4466_v8, 4  ;;  %v3542_v34 = vpack.c.bf16 %v3337_v21, %v3337_v21  ;;  %v760_v8 = vpop.f32.mrf.mxu1 }
 0x134   : > { %v1183_v23 = vor.u32 %v1181_v3, %v4468_v10  ;;  %v1184_v25 = vrot.slane %v4468_v10, 4  ;;  %v1072_v24 = vor.u32 %v1070_v5, %v1069_v17  ;;  %v1074_v28 = vrot.slane %v1069_v17, 4  ;;  %v1401_v17 = vld [vmem:[#allocation2 + $0xc0] sm:$0xf] }
 0x135   : > { %v1208_v30 = vor.u32 %v1206_v7, %v1205_v18  ;;  %v1210_v27 = vrot.slane %v1205_v18, 4  ;;  %v1325_v31 = vsel %vm4300_vm13, %v1047_v11, %v1324_v9  ;;  %v1050_v43 = vshrl.u32 %v3526_v33, 16 }
 0x136   : > { %v1381_v32 = vsel %vm4300_vm13, %v1183_v23, %v1380_v16  ;;  %1326 = vst [vmem:[#allocation2 + $0x3c] sm:$0xf] %v1325_v31  ;;  %v1073_v36 = vsel %vm4334_vm1, %v1065_v50, %v1072_v24  ;;  %v1336_v38 = vsel %vm4181_vm3, %v1074_v28, %v1335_v26  ;;  %v1053_v19 = vshll.u32 %v3526_v33, 16  ;;  %v3692_v50 = vpop.f32.mrf.mxu0  ;;  %v1345_v16 = vld [vmem:[#allocation2 + $0x60] sm:$0xf] }
 0x137   : > { %1382 = vst [vmem:[#allocation2 + $0x9c] sm:$0xf] %v1381_v32  ;;  %v1209_v39 = vsel %vm4334_vm1, %v1201_v52, %v1208_v30  ;;  %v1392_v42 = vsel %vm4181_vm3, %v1210_v27, %v1391_v12  ;;  %1334 = vst.msk [vmem:[#allocation2 + $0x4c] sm:$0xf] %vm297_vm0, %v1073_v36  ;;  %v1186_v44 = vshrl.u32 %v3542_v34, 16  ;;  %v1189_v45 = vshll.u32 %v3542_v34, 16 }
 0x138   : > { %1337 = vst [vmem:[#allocation2 + $0x50] sm:$0x1] %v1336_v38  ;;  %1390 = vst.msk [vmem:[#allocation2 + $0xac] sm:$0xf] %vm297_vm0, %v1209_v39  ;;  %v1052_v46 = vrot.slane %v1050_v43, 7  ;;  %v3326_v48 = vsel %vm793_vm2, 1.0, %v4016_v40  ;;  %v696_v7 = vpop.f32.mrf.mxu0  ;;  %vm794_vm11 = vcmp.ge.f32.partialorder %v3692_v50, %v4280_v37  ;;  %vm810_vm12 = vcmp.ge.f32.partialorder %v3708_v51, %v4280_v37 }
 0x139   : > { %1393 = vst [vmem:[#allocation2 + $0xb0] sm:$0x1] %v1392_v42  ;;  %v1188_v47 = vrot.slane %v1186_v44, 7  ;;  %v3342_v49 = vsel %vm809_vm8, 1.0, %v4016_v40  ;;  %v1328_v52 = vld [vmem:[#allocation2 + $0x44] sm:$0x1]  ;;  %v3531_v54 = vpack.c.bf16 %v3326_v48, %v3326_v48  ;;  %vm792_vm14 = vcmp.ge.f32.partialorder %v696_v7, %v4280_v37 }
 0x13a   : > { %v3547_v55 = vpack.c.bf16 %v3342_v49, %v3342_v49  ;;  %v3324_v56 = vsel %vm791_vm9, 1.0, %v4016_v40  ;;  %v3340_v57 = vsel %vm807_vm10, 1.0, %v4016_v40  ;;  %v1055_v58 = vor.u32 %v1053_v19, %v1052_v46  ;;  %v1338_v32 = vld [vmem:[#allocation2 + $0x54] sm:$0xf] }
 0x13b   : > { %v1057_v59 = vrot.slane %v1052_v46, 4  ;;  %v1191_v60 = vor.u32 %v1189_v45, %v1188_v47  ;;  %v1193_v61 = vrot.slane %v1188_v47, 4  ;;  %v1093_v62 = vshrl.u32 %v3531_v54, 16  ;;  %v1394_v33 = vld [vmem:[#allocation2 + $0xb4] sm:$0xf] }
 0x13c   : > { %v1096_v0 = vshll.u32 %v3531_v54, 16  ;;  %v1229_v1 = vshrl.u32 %v3547_v55, 16  ;;  %v1232_v2 = vshll.u32 %v3547_v55, 16  ;;  %v1056_v3 = vsel %vm4334_vm1, %v1048_v22, %v1055_v58 }
 0x13d   : > { %v1329_v4 = vsel %vm4181_vm3, %v1057_v59, %v1328_v52  ;;  %v1192_v5 = vsel %vm4334_vm1, %v1184_v25, %v1191_v60  ;;  %v1385_v6 = vsel %vm4181_vm3, %v1193_v61, %v1384_v53  ;;  %1327 = vst.msk [vmem:[#allocation2 + $0x40] sm:$0xf] %vm297_vm0, %v1056_v3  ;;  %v1095_v9 = vrot.slane %v1093_v62, 7  ;;  %v1405_v52 = vld [vmem:[#allocation2 + $0xc8] sm:$0x1] }
 0x13e   : > { %1330 = vst [vmem:[#allocation2 + $0x44] sm:$0x1] %v1329_v4  ;;  %1383 = vst.msk [vmem:[#allocation2 + $0xa0] sm:$0xf] %vm297_vm0, %v1192_v5  ;;  %v4510_v10 = vrot.slane %v1229_v1, 7  ;;  %v3529_v14 = vpack.c.bf16 %v3324_v56, %v3324_v56  ;;  %v3545_v15 = vpack.c.bf16 %v3340_v57, %v3340_v57  ;;  %vm808_vm15 = vcmp.ge.f32.partialorder %v760_v8, %v4280_v37 }
 0x13f   : > { %1386 = vst [vmem:[#allocation2 + $0xa4] sm:$0x1] %v1385_v6  ;;  %v1098_v18 = vor.u32 %v1096_v0, %v1095_v9  ;;  %v3327_v12 = vsel %vm794_vm11, 1.0, %v4016_v40  ;;  %v3343_v24 = vsel %vm810_vm12, 1.0, %v4016_v40  ;;  %v3325_v34 = vsel %vm792_vm14, 1.0, %v4016_v40 }
 0x140   : > { %v1234_v20 = vor.u32 %v1232_v2, %v4510_v10  ;;  %v1076_v21 = vshrl.u32 %v3529_v14, 16  ;;  %v1079_v11 = vshll.u32 %v3529_v14, 16  ;;  %v1212_v22 = vshrl.u32 %v3545_v15, 16  ;;  %v1342_v3 = vld [vmem:[#allocation2 + $0x5c] sm:$0x1] }
 0x141   : > { %v1215_v23 = vshll.u32 %v3545_v15, 16  ;;  %v1346_v25 = vsel %vm4300_vm13, %v1098_v18, %v1345_v16  ;;  %v3532_v27 = vpack.c.bf16 %v3327_v12, %v3327_v12  ;;  %v3548_v31 = vpack.c.bf16 %v3343_v24, %v3343_v24  ;;  %v1398_v4 = vld [vmem:[#allocation2 + $0xbc] sm:$0x1] }
 0x142   : > { %v1402_v26 = vsel %vm4300_vm13, %v1234_v20, %v1401_v17  ;;  %1347 = vst [vmem:[#allocation2 + $0x60] sm:$0xf] %v1346_v25  ;;  %v1078_v28 = vrot.slane %v1076_v21, 7  ;;  %v1214_v30 = vrot.slane %v1212_v22, 7  ;;  %v3341_v35 = vsel %vm808_vm15, 1.0, %v4016_v40 }
 0x143   : > { %1403 = vst [vmem:[#allocation2 + $0xc0] sm:$0xf] %v1402_v26  ;;  %v1099_v38 = vrot.slane %v1095_v9, 4  ;;  %v1235_v39 = vrot.slane %v4510_v10, 4  ;;  %v1101_v42 = vshrl.u32 %v3532_v27, 16  ;;  %v1237_v43 = vshrl.u32 %v3548_v31, 16 }
 0x144   : > { %v1081_v29 = vor.u32 %v1079_v11, %v1078_v28  ;;  %v1217_v36 = vor.u32 %v1215_v23, %v1214_v30  ;;  %v3530_v45 = vpack.c.bf16 %v3325_v34, %v3325_v34  ;;  %v3546_v46 = vpack.c.bf16 %v3341_v35, %v3341_v35  ;;  %v1349_v40 = vld [vmem:[#allocation2 + $0x68] sm:$0x1] }
 0x145   : > { %v1103_v47 = vrot.slane %v1101_v42, 7  ;;  %v1104_v37 = vshll.u32 %v3532_v27, 16  ;;  %v1239_v48 = vrot.slane %v1237_v43, 7  ;;  %v1240_v49 = vshll.u32 %v3548_v31, 16 }
 0x146   : > { %v1339_v19 = vsel %vm4300_vm13, %v1081_v29, %v1338_v32  ;;  %v1395_v44 = vsel %vm4300_vm13, %v1217_v36, %v1394_v33  ;;  %v1082_v50 = vrot.slane %v1078_v28, 4  ;;  %v1218_v51 = vrot.slane %v1214_v30, 4 }
 0x147   : > { %1340 = vst [vmem:[#allocation2 + $0x54] sm:$0xf] %v1339_v19  ;;  %1396 = vst [vmem:[#allocation2 + $0xb4] sm:$0xf] %v1395_v44  ;;  %v1084_v53 = vshrl.u32 %v3530_v45, 16  ;;  %v1220_v54 = vshrl.u32 %v3546_v46, 16  ;;  %v1106_v55 = vor.u32 %v1104_v37, %v1103_v47  ;;  %v1242_v57 = vor.u32 %v1240_v49, %v1239_v48 }
 0x148   : > { %v1108_v56 = vrot.slane %v1103_v47, 4  ;;  %v1244_v58 = vrot.slane %v1239_v48, 4  ;;  %v1087_v59 = vshll.u32 %v3530_v45, 16  ;;  %v1223_v61 = vshll.u32 %v3546_v46, 16 }
 0x149   : > { %v1086_v63 = vrot.slane %v1084_v53, 7  ;;  %v1222_v60 = vrot.slane %v1220_v54, 7  ;;  %v1107_v62 = vsel %vm4334_vm1, %v1099_v38, %v1106_v55  ;;  %v1243_v1 = vsel %vm4334_vm1, %v1235_v39, %v1242_v57 }
 0x14a   : > { %v1350_v0 = vsel %vm4181_vm3, %v1108_v56, %v1349_v40  ;;  %v1406_v2 = vsel %vm4181_vm3, %v1244_v58, %v1405_v52  ;;  %1348 = vst.msk [vmem:[#allocation2 + $0x64] sm:$0xf] %vm297_vm0, %v1107_v62  ;;  %1404 = vst.msk [vmem:[#allocation2 + $0xc4] sm:$0xf] %vm297_vm0, %v1243_v1 }
 0x14b   : > { %1351 = vst [vmem:[#allocation2 + $0x68] sm:$0x1] %v1350_v0  ;;  %1407 = vst [vmem:[#allocation2 + $0xc8] sm:$0x1] %v1406_v2  ;;  %v1089_v5 = vor.u32 %v1087_v59, %v1086_v63  ;;  %v1091_v6 = vrot.slane %v1086_v63, 4  ;;  %v1225_v7 = vor.u32 %v1223_v61, %v1222_v60  ;;  %v1227_v8 = vrot.slane %v1222_v60, 4 }
 0x14d   : > { %v1090_v9 = vsel %vm4334_vm1, %v1082_v50, %v1089_v5  ;;  %v1343_v10 = vsel %vm4181_vm3, %v1091_v6, %v1342_v3  ;;  %v1226_v14 = vsel %vm4334_vm1, %v1218_v51, %v1225_v7  ;;  %v1399_v15 = vsel %vm4181_vm3, %v1227_v8, %v1398_v4 }
 0x14e   : > { %1341 = vst.msk [vmem:[#allocation2 + $0x58] sm:$0xf] %vm297_vm0, %v1090_v9  ;;  %1344 = vst [vmem:[#allocation2 + $0x5c] sm:$0x1] %v1343_v10 }
 0x14f   : > { %1397 = vst.msk [vmem:[#allocation2 + $0xb8] sm:$0xf] %vm297_vm0, %v1226_v14  ;;  %1400 = vst [vmem:[#allocation2 + $0xbc] sm:$0x1] %v1399_v15 }
 0x150 PF: > { %s3549_s10 = smul.u32 96, %s3997_s27  ;;  %vm1743_vm13 = vcmask 1042432   ;;  %vm1744_vm4 = vcmask 1046532   ;;  %vm1459_vm5 = vsmask.f32 3328  ;;  %v3867_v41 = vld [vmem:[%s5493_s3 + $0x78] sm:$0xff]  }
 0x151   : > { %vm1460_vm6 = vsmask.f32 7440  ;;  %vm4558_vm1 = vmor %vm1743_vm13, %vm1744_vm4  ;;  %vm1442_vm3 = vcmask 257024   ;;  %3577 = vmatprep.subr.bf16.mxu0 %v3867_v41  ;;  %v3868_v33 = vld [vmem:[%s5493_s3 + $0x38] sm:$0xff]   ;;  %s4017_s22 = smov 32   ;;  %v3869_v39 = vld [vmem:[%s5493_s3 + $0x70] sm:$0xff]  }
 0x152   : > { %s4562_s18 = scalar_lea.vmem [#allocation2], %s3549_s10  ;;  %s4018_s10 = smov 64   ;;  %3578 = vmatpush3.bf16.msra.mxu0 %v3868_v33  ;;  %v3870_v46 = vld [vmem:[%s5493_s3 + $0x30] sm:$0xff]   ;;  %vm4632_vm0 = vmor %vm1459_vm5, %vm1460_vm6  ;;  %v3871_v2 = vld [vmem:[%s5493_s3 + $0x68] sm:$0xff]   ;;  %vm2552_vm7 = vcmask 261120   ;;  %vm1702_vm2 = vcmask 519424  }
 0x153   : > { %3579 = vmatprep.subr.bf16.mxu0 %v3869_v39  ;;  %s4019_s23 = smov 96   ;;  %vm1850_vm8 = vcmask 781824   ;;  %vm1917_vm9 = vcmask 1044224   ;;  %s3551_s11 = sshll.u32 %s3997_s27, 6 }
 0x154   : > { %s5346_s21 = scalar_lea.vmem %s4142_s12, %s3551_s11 }
 0x156   : > { %v4565_v16 = vld [vmem:[%s4562_s18 + $0xc] sm:$0xf]  ;;  %v4568_v17 = vld [vmem:[%s4562_s18 + $0x10] sm:$0xf]  ;;  %v1412_v18 = vld [vmem:[%s4562_s18] sm:$0xf]  ;;  %3580 = vmatpush3.bf16.msra.mxu0 %v3870_v46 }
 0x157   : > { %v3380_v20 = vrot.slane %v4565_v16, 9  ;;  %v1755_v21 = vrot.slane %v4568_v17, 5  ;;  %v1413_v11 = vld [vmem:[%s4562_s18 + $0x4] sm:$0xf]  ;;  %v3379_v22 = vrot.slane %v1412_v18, 9  ;;  %v1463_v23 = vshrl.u32 %v1412_v18, 16  ;;  %3581 = vmatprep.subr.bf16.mxu0 %v3871_v2 }
 0x158   : > { %1443 = vst.msk [vmem:[#allocation3] sm:$0xf] %vm1442_vm3, %v1412_v18  ;;  %1445 = vst.msk [vmem:[#allocation3 + $0x18] sm:$0xf] %vm1442_vm3, %v4565_v16  ;;  %v1748_v25 = vrot.slane %v1413_v11, 5  ;;  %v1466_v24 = vshll.u32 %v1412_v18, 16 }
 0x159   : > { %1446 = vst.msk [vmem:[#allocation3 + $0x24] sm:$0xf] %vm1442_vm3, %v4568_v17  ;;  %v4580_v26 = vld [vmem:[%s4562_s18 + $0x14] sm:$0x1]  ;;  %v4583_v12 = vld [vmem:[%s4562_s18 + $0x18] sm:$0xf]  ;;  %v4588_v28 = vsel %vm4558_vm1, %v3380_v20, %v1755_v21 }
 0x15a   : > { %1444 = vst.msk [vmem:[#allocation3 + $0xc] sm:$0xf] %vm1442_vm3, %v1413_v11  ;;  %v1757_v30 = vrot.slane %v1755_v21, 4  ;;  %v1758_v27 = vrot.slane %v4580_v26, 5  ;;  %v1414_v31 = vld [vmem:[%s4562_s18 + $0x8] sm:$0x1]  ;;  %1998 = vrot.lane.b32.xlu1 %v4588_v28, %s4017_s22  ;;  %v1749_v34 = vsel %vm4558_vm1, %v3379_v22, %v1748_v25 }
 0x15b   : > { %v1465_v32 = vrot.slane %v1463_v23, 4  ;;  %1447 = vst.msk [vmem:[#allocation3 + $0x30] sm:$0xf] %vm1442_vm3, %v4583_v12  ;;  %v1750_v35 = vrot.slane %v1748_v25, 4  ;;  %v1751_v29 = vrot.slane %v1414_v31, 5  ;;  %v1468_v36 = vrot.slane %v1466_v24, 5  ;;  %1802 = vrot.lane.b32.xlu0 %v1749_v34, %s4018_s10 }
 0x15c   : > { %v4602_v38 = vld [vmem:[%s4562_s18 + $0x1c] sm:$0xf]  ;;  %v4610_v42 = vsel %vm4558_vm1, %v1757_v30, %v1758_v27  ;;  %v1472_v43 = vshll.u32 %v1413_v11, 16  ;;  %v1476_v19 = vshrl.u32 %v1413_v11, 16  ;;  %v1482_v44 = vshll.u32 %v1414_v31, 16  ;;  %v3872_v46 = vld [vmem:[%s5493_s3 + $0x28] sm:$0xff]  }
 0x15d   : > { %v4613_v45 = vld [vmem:[%s4562_s18 + $0x20] sm:$0x1]  ;;  %1448 = vst.msk [vmem:[#allocation3 + $0x3c] sm:$0xf] %vm1442_vm3, %v4602_v38  ;;  %v1752_v47 = vsel %vm4558_vm1, %v1750_v35, %v1751_v29  ;;  %v1469_v37 = vor.u32 %v1468_v36, %v1465_v32  ;;  %v1520_v40 = vshll.u32 %v4602_v38, 16  ;;  %v1524_v48 = vshrl.u32 %v4602_v38, 16  ;;  %3582 = vmatpush3.bf16.msra.mxu0 %v3872_v46 }
 0x15e   : > { %v4625_v49 = vld [vmem:[%s4562_s18 + $0x28] sm:$0xf]  ;;  %v4628_v50 = vld [vmem:[%s4562_s18 + $0x24] sm:$0xf]  ;;  %v1474_v52 = vrot.slane %v1472_v43, 5  ;;  %v1478_v53 = vrot.slane %v1476_v19, 4  ;;  %2000 = vrot.lane.b32.xlu1 %v4610_v42, %s4017_s22 }
 0x15f   : > { %v4636_v54 = vrot.slane %v1482_v44, 5  ;;  %v1530_v55 = vshll.u32 %v4613_v45, 16  ;;  %1450 = vst.msk [vmem:[#allocation3 + $0x54] sm:$0xf] %vm1442_vm3, %v4625_v49  ;;  %1449 = vst.msk [vmem:[#allocation3 + $0x48] sm:$0xf] %vm1442_vm3, %v4628_v50  ;;  %2064 = vrot.lane.b32.xlu0 %v4583_v12, %s4018_s10 }
 0x160   : > { %v1470_v56 = vrot.slane %v1469_v37, 4  ;;  %v1522_v57 = vrot.slane %v1520_v40, 5  ;;  %v1526_v58 = vrot.slane %v1524_v48, 4  ;;  %v1511_v63 = vshrl.u32 %v4583_v12, 16  ;;  %v4647_v59 = vld [vmem:[%s4562_s18 + $0x34] sm:$0xf] }
 0x161   : > { %v1479_v60 = vor.u32 %v1478_v53, %v1474_v52  ;;  %v1532_v61 = vrot.slane %v1530_v55, 5  ;;  %v1514_v62 = vshll.u32 %v4583_v12, 16  ;;  %v1496_v0 = vshll.u32 %v4568_v17, 16  ;;  %1452 = vst.msk [vmem:[#allocation3 + $0x6c] sm:$0xf] %vm1442_vm3, %v4647_v59 }
 0x162   : > { %v4656_v1 = vld [vmem:[%s4562_s18 + $0x30] sm:$0xf]  ;;  %v1475_v3 = vsel %vm4632_vm0, %v1470_v56, %v1474_v52  ;;  %v1527_v4 = vor.u32 %v1526_v58, %v1522_v57  ;;  %v1513_v5 = vrot.slane %v1511_v63, 4  ;;  %v1500_v6 = vshrl.u32 %v4568_v17, 16  ;;  %v4667_v7 = vld [vmem:[%s4562_s18 + $0x40] sm:$0xf]  ;;  %1804 = vrot.lane.b32.xlu1 %v1752_v47, %s4018_s10 }
 0x163   : > { %1451 = vst.msk [vmem:[#allocation3 + $0x60] sm:$0xf] %vm1442_vm3, %v4656_v1  ;;  %v1480_v8 = vrot.slane %v1479_v60, 4  ;;  %v1516_v9 = vrot.slane %v1514_v62, 5  ;;  %v1498_v10 = vrot.slane %v1496_v0, 5  ;;  %v1506_v14 = vshll.u32 %v4580_v26, 16  ;;  %1654 = vrot.lane.b32.xlu0 %v1475_v3, %s4017_s22 }
 0x164   : > { %1454 = vst.msk [vmem:[#allocation3 + $0x84] sm:$0xf] %vm1442_vm3, %v4667_v7  ;;  %v4673_v15 = vld [vmem:[%s4562_s18 + $0x3c] sm:$0xf]  ;;  %v1528_v41 = vrot.slane %v1527_v4, 4  ;;  %v1502_v18 = vrot.slane %v1500_v6, 4 }
 0x165   : > { %v1487_v20 = vshrl.u32 %v4565_v16, 16  ;;  %v1490_v21 = vshll.u32 %v4565_v16, 16  ;;  %v4679_v11 = vld [vmem:[%s4562_s18 + $0x2c] sm:$0x1]  ;;  %1453 = vst.msk [vmem:[#allocation3 + $0x78] sm:$0xf] %vm1442_vm3, %v4673_v15  ;;  %v1485_v22 = vsel %vm4632_vm0, %v1480_v8, %v4636_v54  ;;  %v1517_v23 = vor.u32 %v1516_v9, %v1513_v5 }
 0x166   : > { %v1508_v25 = vrot.slane %v1506_v14, 5  ;;  %v1762_v26 = vrot.slane %v4602_v38, 5  ;;  %v4689_v24 = vld [vmem:[%s4562_s18 + $0x4c] sm:$0xf]  ;;  %v4692_v30 = vld [vmem:[%s4562_s18 + $0x48] sm:$0xf]  ;;  %v4696_v27 = vsel %vm4632_vm0, %v1528_v41, %v1532_v61  ;;  %v1503_v31 = vor.u32 %v1502_v18, %v1498_v10  ;;  %2066 = vrot.lane.b32.xlu1 %v4602_v38, %s4018_s10 }
 0x167   : > { %v1489_v32 = vrot.slane %v1487_v20, 4  ;;  %v1492_v33 = vrot.slane %v1490_v21, 5  ;;  %1456 = vst.msk [vmem:[#allocation3 + $0x9c] sm:$0xf] %vm1442_vm3, %v4689_v24  ;;  %1455 = vst.msk [vmem:[#allocation3 + $0x90] sm:$0xf] %vm1442_vm3, %v4692_v30  ;;  %1656 = vrot.lane.b32.xlu0 %v1485_v22, %s4017_s22 }
 0x168   : > { %v1518_v34 = vrot.slane %v1517_v23, 4  ;;  %1977 = vst.msk [vmem:[#allocation3 + $0x28] sm:$0xf] %vm1442_vm3, %v4696_v27  ;;  %v1764_v35 = vrot.slane %v1762_v26, 4  ;;  %v1765_v29 = vrot.slane %v4613_v45, 5  ;;  %v3381_v36 = vrot.slane %v4583_v12, 9 }
 0x169   : > { %v1504_v39 = vrot.slane %v1503_v31, 4  ;;  %v1493_v43 = vor.u32 %v1492_v33, %v1489_v32  ;;  %v1544_v19 = vshll.u32 %v4625_v49, 16  ;;  %v1548_v44 = vshrl.u32 %v4625_v49, 16  ;;  %v4728_v48 = vld [vmem:[%s4562_s18 + $0x38] sm:$0x1]  ;;  %v3873_v52 = vld [vmem:[%s5493_s3 + $0x60] sm:$0xff]  }
 0x16a   : > { %v4716_v45 = vsel %vm4632_vm0, %v1518_v34, %v1522_v57  ;;  %v4720_v47 = vsel %vm4558_vm1, %v1764_v35, %v1765_v29  ;;  %v4724_v37 = vsel %vm4558_vm1, %v3381_v36, %v1762_v26  ;;  %v1554_v40 = vshll.u32 %v4679_v11, 16  ;;  %v3874_v57 = vld [vmem:[%s5493_s3 + $0x20] sm:$0xff]   ;;  %3583 = vmatprep.subr.bf16.mxu0 %v3873_v52  ;;  %1871 = vrot.lane.b32.xlu1 %v4568_v17, %s4019_s23  ;;  %v3876_v31 = vld [vmem:[%s5493_s3 + $0x18] sm:$0xff]   ;;  %v3878_v52 = vld [vmem:[%s5493_s3 + $0x10] sm:$0xff]  }
 0x16b   : > { %v4735_v53 = vsel %vm4632_vm0, %v1504_v39, %v1508_v25  ;;  %1976 = vst.msk [vmem:[#allocation3 + $0x1c] sm:$0xf] %vm1442_vm3, %v4716_v45  ;;  %v1494_v54 = vrot.slane %v1493_v43, 4  ;;  %2241 = vst.msk [vmem:[#allocation3 + $0x14] sm:$0xf] %vm1442_vm3, %v4720_v47  ;;  %v1546_v55 = vrot.slane %v1544_v19, 5  ;;  %1869 = vrot.lane.b32.xlu0 %v4565_v16, %s4019_s23  ;;  %3584 = vmatpush3.bf16.msra.mxu0 %v3874_v57 }
 0x16c   : > { %2240 = vst.msk [vmem:[#allocation3 + $0x8] sm:$0xf] %vm1442_vm3, %v4724_v37  ;;  %v1550_v56 = vrot.slane %v1548_v44, 4  ;;  %1975 = vst.msk [vmem:[#allocation3 + $0x10] sm:$0xf] %vm1442_vm3, %v4735_v53  ;;  %v1556_v58 = vrot.slane %v1554_v40, 5 }
 0x16d   : > { %v1535_v63 = vshrl.u32 %v4628_v50, 16  ;;  %v1538_v60 = vshll.u32 %v4628_v50, 16  ;;  %v1769_v61 = vrot.slane %v4625_v49, 5  ;;  %v1499_v62 = vsel %vm4632_vm0, %v1494_v54, %v1498_v10  ;;  %v4768_v41 = vld [vmem:[%s4562_s18 + $0x44] sm:$0x1]  ;;  %v3875_v16 = vld [vmem:[%s5493_s3 + $0x58] sm:$0xff]  }
 0x16e   : > { %v1551_v0 = vor.u32 %v1550_v56, %v1546_v55  ;;  %v1772_v2 = vrot.slane %v4679_v11, 5  ;;  %v3382_v3 = vrot.slane %v4628_v50, 9  ;;  %1974 = vst.msk [vmem:[#allocation3 + $0x4] sm:$0xf] %vm1442_vm3, %v1499_v62  ;;  %v1568_v8 = vshll.u32 %v4647_v59, 16  ;;  %2154 = vrot.lane.b32.xlu1 %v4696_v27, %s4019_s23  ;;  %3585 = vmatprep.subr.bf16.mxu0 %v3875_v16  ;;  %v3877_v19 = vld [vmem:[%s5493_s3 + $0x50] sm:$0xff]  }
 0x16f   : > { %v1537_v4 = vrot.slane %v1535_v63, 4  ;;  %v1540_v5 = vrot.slane %v1538_v60, 5  ;;  %v1771_v6 = vrot.slane %v1769_v61, 4  ;;  %v1572_v10 = vshrl.u32 %v4647_v59, 16  ;;  %2152 = vrot.lane.b32.xlu0 %v4716_v45, %s4019_s23  ;;  %3586 = vmatpush3.bf16.msra.mxu0 %v3876_v31  ;;  %v4826_v63 = vld [vmem:[%s4562_s18 + $0x58] sm:$0xf] }
 0x170   : > { %v1552_v9 = vrot.slane %v1551_v0, 4  ;;  %v4763_v17 = vsel %vm4558_vm1, %v3382_v3, %v1769_v61  ;;  %v1578_v14 = vshll.u32 %v4728_v48, 16  ;;  %v1570_v21 = vrot.slane %v1568_v8, 5  ;;  %3587 = vmatprep.subr.bf16.mxu0 %v3877_v19  ;;  %1458 = vst.msk [vmem:[#allocation3 + $0xb4] sm:$0xf] %vm1442_vm3, %v4826_v63  ;;  %v3880_v8 = vld [vmem:[%s5493_s3 + $0x8] sm:$0xff]  }
 0x171   : > { %v1541_v18 = vor.u32 %v1540_v5, %v1537_v4  ;;  %v4775_v20 = vsel %vm4558_vm1, %v1771_v6, %v1772_v2  ;;  %2242 = vst.msk [vmem:[#allocation3 + $0x20] sm:$0xf] %vm1442_vm3, %v4763_v17  ;;  %v1559_v11 = vshrl.u32 %v4656_v1, 16  ;;  %v1574_v23 = vrot.slane %v1572_v10, 4  ;;  %v4839_v2 = vld [vmem:[%s4562_s18 + $0x54] sm:$0xf] }
 0x172   : > { %v4784_v22 = vsel %vm4632_vm0, %v1552_v9, %v1556_v58  ;;  %2243 = vst.msk [vmem:[#allocation3 + $0x2c] sm:$0xf] %vm1442_vm3, %v4775_v20  ;;  %v1580_v25 = vrot.slane %v1578_v14, 5  ;;  %v1562_v26 = vshll.u32 %v4656_v1, 16  ;;  %v1776_v34 = vrot.slane %v4647_v59, 5  ;;  %1660 = vrot.lane.b32.xlu1 %v4735_v53, %s4017_s22 }
 0x173   : > { %1979 = vst.msk [vmem:[#allocation3 + $0x40] sm:$0xf] %vm1442_vm3, %v4784_v22  ;;  %v1542_v32 = vrot.slane %v1541_v18, 4  ;;  %v1561_v33 = vrot.slane %v1559_v11, 4  ;;  %v1779_v35 = vrot.slane %v4728_v48, 5  ;;  %v1575_v29 = vor.u32 %v1574_v23, %v1570_v21  ;;  %1658 = vrot.lane.b32.xlu0 %v1499_v62, %s4017_s22  ;;  %v3879_v62 = vld [vmem:[%s5493_s3 + $0x48] sm:$0xff]   ;;  %3588 = vmatpush3.bf16.msra.mxu0 %v3878_v52 }
 0x174   : > { %v1564_v36 = vrot.slane %v1562_v26, 5  ;;  %v3383_v39 = vrot.slane %v4656_v1, 9  ;;  %v1592_v43 = vshll.u32 %v4667_v7, 16  ;;  %v1778_v46 = vrot.slane %v1776_v34, 4  ;;  %v4823_v58 = vld [vmem:[%s4562_s18 + $0x50] sm:$0x1]  ;;  %3589 = vmatprep.subr.bf16.mxu0 %v3879_v62 }
 0x175   : > { %v4805_v44 = vsel %vm4632_vm0, %v1542_v32, %v1546_v55  ;;  %v1596_v40 = vshrl.u32 %v4667_v7, 16  ;;  %v1602_v48 = vshll.u32 %v4768_v41, 16  ;;  %v1576_v54 = vrot.slane %v1575_v29, 4  ;;  %1457 = vst.msk [vmem:[#allocation3 + $0xa8] sm:$0xf] %vm1442_vm3, %v4839_v2  ;;  %v3881_v18 = vld [vmem:[%s5493_s3 + $0x88] sm:$0xff]  }
 0x176   : > { %1978 = vst.msk [vmem:[#allocation3 + $0x34] sm:$0xf] %vm1442_vm3, %v4805_v44  ;;  %v1565_v56 = vor.u32 %v1564_v36, %v1561_v33  ;;  %v4818_v55 = vsel %vm4558_vm1, %v3383_v39, %v1776_v34  ;;  %v4820_v57 = vrot.slane %v1592_v43, 5  ;;  %v4831_v53 = vsel %vm4558_vm1, %v1778_v46, %v1779_v35  ;;  %2004 = vrot.lane.b32.xlu1 %v4720_v47, %s4017_s22  ;;  %v3883_v34 = vld [vmem:[%s5493_s3] sm:$0xff]  }
 0x177   : > { %2244 = vst.msk [vmem:[#allocation3 + $0x38] sm:$0xf] %vm1442_vm3, %v4818_v55  ;;  %v1598_v60 = vrot.slane %v1596_v40, 4  ;;  %v1604_v61 = vrot.slane %v1602_v48, 5  ;;  %v1583_v0 = vshrl.u32 %v4673_v15, 16  ;;  %v4846_v3 = vsel %vm4632_vm0, %v1576_v54, %v1580_v25  ;;  %2002 = vrot.lane.b32.xlu0 %v4724_v37, %s4017_s22  ;;  %3709 = vmatprep.subr.bf16.mxu1 %v3881_v18  ;;  %v3884_v40 = vld [vmem:[%s5493_s3 + $0x80] sm:$0xff]  }
 0x178   : > { %v1566_v4 = vrot.slane %v1565_v56, 4  ;;  %2245 = vst.msk [vmem:[#allocation3 + $0x44] sm:$0xf] %vm1442_vm3, %v4831_v53  ;;  %v1586_v5 = vshll.u32 %v4673_v15, 16  ;;  %v1783_v6 = vrot.slane %v4667_v7, 5  ;;  %v1786_v14 = vrot.slane %v4768_v41, 5  ;;  %3590 = vmatpush3.bf16.msra.mxu0 %v3880_v8  ;;  %3710 = vmatpush3.bf16.msra.mxu1 %v3881_v18 }
 0x179   : > { %1981 = vst.msk [vmem:[#allocation3 + $0x58] sm:$0xf] %vm1442_vm3, %v4846_v3  ;;  %v1599_v9 = vor.u32 %v1598_v60, %v4820_v57  ;;  %v1585_v10 = vrot.slane %v1583_v0, 4  ;;  %v3384_v16 = vrot.slane %v4673_v15, 9  ;;  %v1616_v26 = vshll.u32 %v4689_v24, 16  ;;  %v3882_v41 = vld [vmem:[%s5493_s3 + $0x40] sm:$0xff]   ;;  %3711 = vmatprep.subr.bf16.mxu1 %v3884_v40 }
 0x17a   : > { %v4869_v11 = vsel %vm4632_vm0, %v1566_v4, %v1570_v21  ;;  %v1588_v23 = vrot.slane %v1586_v5, 5  ;;  %v1785_v25 = vrot.slane %v1783_v6, 4  ;;  %v1620_v21 = vshrl.u32 %v4689_v24, 16  ;;  %3591 = vmatprep.subr.bf16.mxu0 %v3882_v41  ;;  %1808 = vrot.lane.b32.xlu1 %v4610_v42, %s4018_s10  ;;  %v1435_v5 = vld [vmem:[%s4562_s18 + $0x5c] sm:$0x1] }
 0x17b   : > { %1980 = vst.msk [vmem:[#allocation3 + $0x4c] sm:$0xf] %vm1442_vm3, %v4869_v11  ;;  %v1600_v31 = vrot.slane %v1599_v9, 4  ;;  %v4881_v32 = vsel %vm4558_vm1, %v3384_v16, %v1783_v6  ;;  %v1626_v33 = vshll.u32 %v4823_v58, 16  ;;  %v1618_v36 = vrot.slane %v1616_v26, 5  ;;  %1806 = vrot.lane.b32.xlu0 %v4588_v28, %s4018_s10 }
 0x17c   : > { %v1589_v35 = vor.u32 %v1588_v23, %v1585_v10  ;;  %v4890_v29 = vsel %vm4558_vm1, %v1785_v25, %v1786_v14  ;;  %2246 = vst.msk [vmem:[#allocation3 + $0x50] sm:$0xf] %vm1442_vm3, %v4881_v32  ;;  %v1607_v39 = vshrl.u32 %v4692_v30, 16  ;;  %v1622_v19 = vrot.slane %v1620_v21, 4  ;;  %3592 = vmatpush3.bf16.msra.mxu0 %v3883_v34  ;;  %3712 = vmatpush3.bf16.msra.mxu1 %v3884_v40 }
 0x17d   : > { %v4897_v43 = vsel %vm4632_vm0, %v1600_v31, %v1604_v61  ;;  %2247 = vst.msk [vmem:[#allocation3 + $0x5c] sm:$0xf] %vm1442_vm3, %v4890_v29  ;;  %v1610_v46 = vshll.u32 %v4692_v30, 16  ;;  %v1628_v52 = vrot.slane %v1626_v33, 5  ;;  %v1790_v56 = vrot.slane %v4689_v24, 5 }
 0x17e   : > { %1983 = vst.msk [vmem:[#allocation3 + $0x70] sm:$0xf] %vm1442_vm3, %v4897_v43  ;;  %v1590_v48 = vrot.slane %v1589_v35, 4  ;;  %v1609_v54 = vrot.slane %v1607_v39, 4  ;;  %v1623_v60 = vor.u32 %v1622_v19, %v1618_v36  ;;  %v1793_v0 = vrot.slane %v4823_v58, 5  ;;  %2070 = vrot.lane.b32.xlu1 %v4625_v49, %s4018_s10 }
 0x17f   : > { %v1612_v61 = vrot.slane %v1610_v46, 5  ;;  %v3385_v62 = vrot.slane %v4692_v30, 9  ;;  %v1792_v4 = vrot.slane %v1790_v56, 4  ;;  %v1640_v8 = vshll.u32 %v4826_v63, 16  ;;  %2068 = vrot.lane.b32.xlu0 %v4628_v50, %s4018_s10  ;;  %v3888_v39 = vld [vmem:[#allocation3 + $0x8] ss:$12 sps:$4 sm:$0xff]  }
 0x180   : > { %v4917_v42 = vsel %vm4632_vm0, %v1590_v48, %v4820_v57  ;;  %v1624_v28 = vrot.slane %v1623_v60, 4  ;;  %v1644_v9 = vshrl.u32 %v4826_v63, 16  ;;  %v1650_v10 = vshll.u32 %v1435_v5, 16  ;;  %v3889_v46 = vld [vmem:[#allocation3 + $0x20] ss:$12 sps:$4 sm:$0xff]   ;;  %3713 = vmatprep.mubr.msk.bf16.mxu1 %vm2552_vm7, %v3888_v39 }
 0x181   : > { %1982 = vst.msk [vmem:[#allocation3 + $0x64] sm:$0xf] %vm1442_vm3, %v4917_v42  ;;  %v1613_v6 = vor.u32 %v1612_v61, %v1609_v54  ;;  %v4924_v58 = vsel %vm4558_vm1, %v3385_v62, %v1790_v56  ;;  %v4931_v57 = vsel %vm4558_vm1, %v1792_v4, %v1793_v0  ;;  %v1631_v14 = vshrl.u32 %v4839_v2, 16  ;;  %v4962_v54 = vld [vmem:[%s4562_s18 + $0x64] sm:$0xf]  ;;  %3714 = vmatmul.mubr.msk.bf16.vlgmr.msra.gmra.mxu1 %vm2552_vm7, %v3889_v46 }
 0x182   : > { %2248 = vst.msk [vmem:[#allocation3 + $0x68] sm:$0xf] %vm1442_vm3, %v4924_v58  ;;  %v4941_v16 = vsel %vm4632_vm0, %v1624_v28, %v1628_v52  ;;  %2249 = vst.msk [vmem:[#allocation3 + $0x74] sm:$0xf] %vm1442_vm3, %v4931_v57  ;;  %v1642_v23 = vrot.slane %v1640_v8, 5  ;;  %v1634_v25 = vshll.u32 %v4839_v2, 16  ;;  %1875 = vrot.lane.b32.xlu1 %v4602_v38, %s4019_s23 }
 0x183   : > { %v1614_v18 = vrot.slane %v1613_v6, 4  ;;  %1985 = vst.msk [vmem:[#allocation3 + $0x88] sm:$0xf] %vm1442_vm3, %v4941_v16  ;;  %v1646_v26 = vrot.slane %v1644_v9, 4  ;;  %v1652_v41 = vrot.slane %v1650_v10, 5  ;;  %v1633_v31 = vrot.slane %v1631_v14, 4  ;;  %1873 = vrot.lane.b32.xlu0 %v4583_v12, %s4019_s23 }
 0x184   : > { %v1636_v33 = vrot.slane %v1634_v25, 5  ;;  %v1797_v34 = vrot.slane %v4826_v63, 5  ;;  %v1800_v40 = vrot.slane %v1435_v5, 5  ;;  %v3386_v52 = vrot.slane %v4839_v2, 9  ;;  %v4965_v38 = vld [vmem:[%s4562_s18 + $0x60] sm:$0xf] }
 0x185   : > { %v4950_v21 = vsel %vm4632_vm0, %v1614_v18, %v1618_v36  ;;  %v1647_v35 = vor.u32 %v1646_v26, %v1642_v23  ;;  %v1438_v12 = vld [vmem:[%s4562_s18 + $0x68] sm:$0x1]  ;;  %v1944_v61 = vshll.u32 %v4962_v54, 16  ;;  %v1948_v0 = vshrl.u32 %v4962_v54, 16 }
 0x186   : > { %1984 = vst.msk [vmem:[#allocation3 + $0x7c] sm:$0xf] %vm1442_vm3, %v4950_v21  ;;  %v1637_v19 = vor.u32 %v1636_v33, %v1633_v31  ;;  %v1799_v36 = vrot.slane %v1797_v34, 4  ;;  %2158 = vrot.lane.b32.xlu1 %v4784_v22, %s4019_s23  ;;  %v4985_v4 = vsel %vm4558_vm1, %v3386_v52, %v1797_v34  ;;  %v1954_v5 = vshll.u32 %v1438_v12, 16 }
 0x187   : > { %v1648_v48 = vrot.slane %v1647_v35, 4  ;;  %v1935_v28 = vshrl.u32 %v4965_v38, 16  ;;  %2156 = vrot.lane.b32.xlu0 %v4805_v44, %s4019_s23  ;;  %2250 = vst.msk [vmem:[#allocation3 + $0x80] sm:$0xf] %vm1442_vm3, %v4985_v4  ;;  %v1946_v8 = vrot.slane %v1944_v61, 5  ;;  %v1950_v9 = vrot.slane %v1948_v0, 4 }
 0x188   : > { %v1638_v56 = vrot.slane %v1637_v19, 4  ;;  %v4970_v60 = vsel %vm4558_vm1, %v1799_v36, %v1800_v40  ;;  %v1938_v10 = vshll.u32 %v4965_v38, 16  ;;  %v1956_v14 = vrot.slane %v1954_v5, 5 }
 0x189   : > { %v4979_v62 = vsel %vm4632_vm0, %v1648_v48, %v1652_v41  ;;  %2251 = vst.msk [vmem:[#allocation3 + $0x8c] sm:$0xf] %vm1442_vm3, %v4970_v60  ;;  %v1937_v18 = vrot.slane %v1935_v28, 4  ;;  %v1993_v25 = vrot.slane %v4962_v54, 5  ;;  %v1996_v26 = vrot.slane %v1438_v12, 5 }
 0x18a   : > { %1987 = vst.msk [vmem:[#allocation3 + $0xa0] sm:$0xf] %vm1442_vm3, %v4979_v62  ;;  %v4994_v6 = vsel %vm4632_vm0, %v1638_v56, %v1642_v23  ;;  %v1951_v41 = vor.u32 %v1950_v9, %v1946_v8  ;;  %v1940_v31 = vrot.slane %v1938_v10, 5  ;;  %v3387_v23 = vrot.slane %v4965_v38, 9  ;;  %1664 = vrot.lane.b32.xlu1 %v4696_v27, %s4017_s22  ;;  %v5033_v48 = vld [vmem:[%s4562_s18 + $0x6c] sm:$0xf] }
 0x18b   : > { %1986 = vst.msk [vmem:[#allocation3 + $0x94] sm:$0xf] %vm1442_vm3, %v4994_v6  ;;  %v1995_v33 = vrot.slane %v1993_v25, 4  ;;  %1662 = vrot.lane.b32.xlu0 %v4716_v45, %s4017_s22  ;;  %v5024_v45 = vld [vmem:[%s4562_s18 + $0x70] sm:$0xf]  ;;  %v3388_v12 = vrot.slane %v5033_v48, 9 }
 0x18c   : > { %v1952_v34 = vrot.slane %v1951_v41, 4  ;;  %v1941_v35 = vor.u32 %v1940_v31, %v1937_v18  ;;  %v5009_v39 = vsel %vm4558_vm1, %v3387_v23, %v1993_v25  ;;  %v2138_v36 = vshll.u32 %v5024_v45, 16  ;;  %v1441_v28 = vld [vmem:[%s4562_s18 + $0x74] sm:$0x1]  ;;  %v3900_v13 = vld [vmem:[#allocation3 + $0x68] ss:$12 sps:$4 sm:$0xff]  }
 0x18d   : > { %v5013_v19 = vsel %vm4558_vm1, %v1995_v33, %v1996_v26  ;;  %2252 = vst.msk [vmem:[#allocation3 + $0x98] sm:$0xf] %vm1442_vm3, %v5009_v39  ;;  %v2142_v40 = vshrl.u32 %v5024_v45, 16  ;;  %v2219_v56 = vrot.slane %v5024_v45, 5  ;;  %v2148_v9 = vshll.u32 %v1441_v28, 16  ;;  %s4021_s18 = smov [#allocation4]  }
 0x18e   : > { %v5019_v27 = vsel %vm4632_vm0, %v1952_v34, %v1956_v14  ;;  %v1942_v46 = vrot.slane %v1941_v35, 4  ;;  %2253 = vst.msk [vmem:[#allocation3 + $0xa4] sm:$0xf] %vm1442_vm3, %v5013_v19  ;;  %2008 = vrot.lane.b32.xlu1 %v4775_v20, %s4017_s22  ;;  %v5045_v61 = vrot.slane %v2138_v36, 5  ;;  %v2222_v25 = vrot.slane %v1441_v28, 5 }
 0x18f   : > { %1989 = vst.msk [vmem:[#allocation3 + $0xb8] sm:$0xf] %vm1442_vm3, %v5019_v27  ;;  %2006 = vrot.lane.b32.xlu0 %v4763_v17, %s4017_s22  ;;  %v2144_v0 = vrot.slane %v2142_v40, 4  ;;  %v2220_v5 = vsel %vm4558_vm1, %v3388_v12, %v2219_v56  ;;  %v2221_v10 = vrot.slane %v2219_v56, 4  ;;  %v5058_v18 = vrot.slane %v2148_v9, 5 }
 0x190   : > { %v5039_v52 = vsel %vm4632_vm0, %v1942_v46, %v1946_v8  ;;  %2254 = vst.msk [vmem:[#allocation3 + $0xb0] sm:$0xf] %vm1442_vm3, %v2220_v5  ;;  %v3894_v26 = vld [vmem:[#allocation3 + $0x38] ss:$12 sps:$4 sm:$0xff]   ;;  %v3895_v41 = vld [vmem:[#allocation3 + $0x50] ss:$12 sps:$4 sm:$0xff]  }
 0x191   : > { %1988 = vst.msk [vmem:[#allocation3 + $0xac] sm:$0xf] %vm1442_vm3, %v5039_v52  ;;  %v2145_v8 = vor.u32 %v2144_v0, %v5045_v61  ;;  %3717 = vmatprep.mubr.msk.bf16.mxu1 %vm2552_vm7, %v3894_v26  ;;  %v2132_v5 = vshll.u32 %v5033_v48, 16 }
 0x192   : > { %1812 = vrot.lane.b32.xlu1 %v4720_v47, %s4018_s10  ;;  %3718 = vmatmul.mubr.msk.bf16.gmra.mxu1 %vm2552_vm7, %v3895_v41 }
 0x193   : > { %1810 = vrot.lane.b32.xlu0 %v4724_v37, %s4018_s10  ;;  %v5056_v14 = vrot.slane %v2145_v8, 4  ;;  %v2223_v37 = vsel %vm4558_vm1, %v2221_v10, %v2222_v25  ;;  %3721 = vmatprep.mubr.msk.bf16.mxu1 %vm2552_vm7, %v3900_v13  ;;  %v2134_v8 = vrot.slane %v2132_v5, 5 }
 0x194   : > { %2255 = vst.msk [vmem:[#allocation3 + $0xbc] sm:$0xf] %vm1442_vm3, %v2223_v37 }
 0x195   : > { %v2151_v47 = vsel %vm4632_vm0, %v5056_v14, %v5058_v18 }
 0x196   : > { %2074 = vrot.lane.b32.xlu1 %v4647_v59, %s4018_s10 }
 0x197   : > { %2072 = vrot.lane.b32.xlu0 %v4656_v1, %s4018_s10 }
 0x19a   : > { %1879 = vrot.lane.b32.xlu1 %v4625_v49, %s4019_s23 }
 0x19b   : > { %1877 = vrot.lane.b32.xlu0 %v4628_v50, %s4019_s23  ;;  %v3901_v50 = vld [vmem:[#allocation3 + $0x80] ss:$12 sps:$4 sm:$0xff]   ;;  %v3907_v46 = vld [vmem:[#allocation3 + $0xb0] ss:$12 sps:$4 sm:$0xff]  }
 0x19c   : > { %3722 = vmatmul.mubr.msk.bf16.gmra.mxu1 %vm2552_vm7, %v3901_v50 }
 0x19e   : > { %2162 = vrot.lane.b32.xlu1 %v4846_v3, %s4019_s23 }
 0x19f   : > { %2160 = vrot.lane.b32.xlu0 %v4869_v11, %s4019_s23 }
 0x1a2   : > { %1668 = vrot.lane.b32.xlu1 %v4784_v22, %s4017_s22 }
 0x1a3   : > { %1666 = vrot.lane.b32.xlu0 %v4805_v44, %s4017_s22 }
 0x1a6   : > { %2012 = vrot.lane.b32.xlu1 %v4831_v53, %s4017_s22 }
 0x1a7   : > { %2010 = vrot.lane.b32.xlu0 %v4818_v55, %s4017_s22 }
 0x1aa   : > { %1816 = vrot.lane.b32.xlu1 %v4775_v20, %s4018_s10 }
 0x1ab   : > { %1814 = vrot.lane.b32.xlu0 %v4763_v17, %s4018_s10 }
 0x1ae   : > { %2078 = vrot.lane.b32.xlu1 %v4667_v7, %s4018_s10 }
 0x1af   : > { %2076 = vrot.lane.b32.xlu0 %v4673_v15, %s4018_s10 }
 0x1b2   : > { %1883 = vrot.lane.b32.xlu1 %v4647_v59, %s4019_s23 }
 0x1b3   : > { %1881 = vrot.lane.b32.xlu0 %v4656_v1, %s4019_s23 }
 0x1b6   : > { %2166 = vrot.lane.b32.xlu1 %v4897_v43, %s4019_s23 }
 0x1b7   : > { %2164 = vrot.lane.b32.xlu0 %v4917_v42, %s4019_s23 }
 0x1ba   : > { %1672 = vrot.lane.b32.xlu1 %v4846_v3, %s4017_s22 }
 0x1bb   : > { %1670 = vrot.lane.b32.xlu0 %v4869_v11, %s4017_s22 }
 0x1be   : > { %2016 = vrot.lane.b32.xlu1 %v4890_v29, %s4017_s22 }
 0x1bf   : > { %2014 = vrot.lane.b32.xlu0 %v4881_v32, %s4017_s22 }
 0x1c2   : > { %1820 = vrot.lane.b32.xlu1 %v4831_v53, %s4018_s10 }
 0x1c3   : > { %1818 = vrot.lane.b32.xlu0 %v4818_v55, %s4018_s10 }
 0x1c6   : > { %2082 = vrot.lane.b32.xlu1 %v4689_v24, %s4018_s10 }
 0x1c7   : > { %2080 = vrot.lane.b32.xlu0 %v4692_v30, %s4018_s10 }
 0x1ca   : > { %1887 = vrot.lane.b32.xlu1 %v4667_v7, %s4019_s23 }
 0x1cb   : > { %1885 = vrot.lane.b32.xlu0 %v4673_v15, %s4019_s23 }
 0x1cc   : > { %v1999_v49 = vpop.permute.xlu1 %1998 }
 0x1cd   : > { %2046 = vst.msk [vmem:[#allocation3 + $0x4] sm:$0xf] %vm1702_vm2, %v1999_v49  ;;  %v1803_v59 = vpop.permute.xlu0 %1802 }
 0x1ce   : > { %2170 = vrot.lane.b32.xlu1 %v4941_v16, %s4019_s23 }
 0x1cf   : > { %2168 = vrot.lane.b32.xlu0 %v4950_v21, %s4019_s23 }
 0x1d0   : > { %v2001_v1 = vpop.permute.xlu1 %2000 }
 0x1d1   : > { %2047 = vst.msk [vmem:[#allocation3 + $0x10] sm:$0xf] %vm1702_vm2, %v2001_v1  ;;  %v2065_v7 = vpop.permute.xlu0 %2064 }
 0x1d2   : > { %2112 = vst.msk [vmem:[#allocation3 + $0x4] sm:$0xf] %vm1850_vm8, %v2065_v7  ;;  %1676 = vrot.lane.b32.xlu1 %v4897_v43, %s4017_s22 }
 0x1d3   : > { %1674 = vrot.lane.b32.xlu0 %v4917_v42, %s4017_s22 }
 0x1d4   : > { %v1805_v15 = vpop.permute.xlu1 %1804 }
 0x1d5   : > { %v1655_v17 = vpop.permute.xlu0 %1654 }
 0x1d6   : > { %1703 = vst.msk [vmem:[#allocation3] sm:$0xf] %vm1702_vm2, %v1655_v17  ;;  %2020 = vrot.lane.b32.xlu1 %v4931_v57, %s4017_s22 }
 0x1d7   : > { %1851 = vst.msk [vmem:[#allocation3] sm:$0xf] %vm1850_vm8, %v1803_v59  ;;  %2018 = vrot.lane.b32.xlu0 %v4924_v58, %s4017_s22 }
 0x1d8   : > { %v2067_v20 = vpop.permute.xlu1 %2066 }
 0x1d9   : > { %2113 = vst.msk [vmem:[#allocation3 + $0x10] sm:$0xf] %vm1850_vm8, %v2067_v20  ;;  %v1657_v22 = vpop.permute.xlu0 %1656 }
 0x1da   : > { %1704 = vst.msk [vmem:[#allocation3 + $0xc] sm:$0xf] %vm1702_vm2, %v1657_v22  ;;  %1824 = vrot.lane.b32.xlu1 %v4890_v29, %s4018_s10 }
 0x1db   : > { %1852 = vst.msk [vmem:[#allocation3 + $0xc] sm:$0xf] %vm1850_vm8, %v1805_v15  ;;  %1822 = vrot.lane.b32.xlu0 %v4881_v32, %s4018_s10 }
 0x1dc   : > { %v1872_v44 = vpop.permute.xlu1 %1871 }
 0x1dd   : > { %1919 = vst.msk [vmem:[#allocation3 + $0xc] sm:$0xf] %vm1917_vm9, %v1872_v44  ;;  %v1870_v55 = vpop.permute.xlu0 %1869 }
 0x1de   : > { %1918 = vst.msk [vmem:[#allocation3] sm:$0xf] %vm1917_vm9, %v1870_v55  ;;  %2086 = vrot.lane.b32.xlu1 %v4826_v63, %s4018_s10 }
 0x1df   : > { %2084 = vrot.lane.b32.xlu0 %v4839_v2, %s4018_s10 }
 0x1e0   : > { %v2155_v53 = vpop.permute.xlu1 %2154 }
 0x1e1   : > { %2201 = vst.msk [vmem:[#allocation3 + $0x10] sm:$0xf] %vm1917_vm9, %v2155_v53  ;;  %v2153_v3 = vpop.permute.xlu0 %2152 }
 0x1e2   : > { %2200 = vst.msk [vmem:[#allocation3 + $0x4] sm:$0xf] %vm1917_vm9, %v2153_v3  ;;  %1891 = vrot.lane.b32.xlu1 %v4689_v24, %s4019_s23 }
 0x1e3   : > { %1889 = vrot.lane.b32.xlu0 %v4692_v30, %s4019_s23 }
 0x1e4   : > { %v1661_v11 = vpop.permute.xlu1 %1660 }
 0x1e5   : > { %1706 = vst.msk [vmem:[#allocation3 + $0x24] sm:$0xf] %vm1702_vm2, %v1661_v11  ;;  %v1659_v32 = vpop.permute.xlu0 %1658  ;;  %v3885_v24 = vld [vmem:[#allocation3] ss:$12 sps:$4 sm:$0xff]  }
 0x1e6   : > { %1705 = vst.msk [vmem:[#allocation3 + $0x18] sm:$0xf] %vm1702_vm2, %v1659_v32  ;;  %2174 = vrot.lane.b32.xlu1 %v4979_v62, %s4019_s23 }
 0x1e7   : > { %2172 = vrot.lane.b32.xlu0 %v4994_v6, %s4019_s23 }
 0x1e8   : > { %v2005_v29 = vpop.permute.xlu1 %2004 }
 0x1e9   : > { %2049 = vst.msk [vmem:[#allocation3 + $0x28] sm:$0xf] %vm1702_vm2, %v2005_v29  ;;  %v2003_v43 = vpop.permute.xlu0 %2002  ;;  %v3887_v42 = vld [vmem:[#allocation3 + $0x4] ss:$12 sps:$4 sm:$0xff]  }
 0x1ea   : > { %2048 = vst.msk [vmem:[#allocation3 + $0x1c] sm:$0xf] %vm1702_vm2, %v2003_v43  ;;  %1680 = vrot.lane.b32.xlu1 %v4941_v16, %s4017_s22  ;;  %2609 = vmatprep.mubr.bf16.mxu0 %v3887_v42 }
 0x1eb   : > { %1678 = vrot.lane.b32.xlu0 %v4950_v21, %s4017_s22  ;;  %2610 = vmatmul.mubr.bf16.vlgmr.msra.gmra.mxu0 %v3885_v24 }
 0x1ec   : > { %v1809_v30 = vpop.permute.xlu1 %1808 }
 0x1ed   : > { %1854 = vst.msk [vmem:[#allocation3 + $0x24] sm:$0xf] %vm1850_vm8, %v1809_v30  ;;  %v1807_v31 = vpop.permute.xlu0 %1806 }
 0x1ee   : > { %1853 = vst.msk [vmem:[#allocation3 + $0x18] sm:$0xf] %vm1850_vm8, %v1807_v31  ;;  %2024 = vrot.lane.b32.xlu1 %v4970_v60, %s4017_s22 }
 0x1ef   : > { %2022 = vrot.lane.b32.xlu0 %v4985_v4, %s4017_s22 }
 0x1f0   : > { %v2071_v23 = vpop.permute.xlu1 %2070 }
 0x1f1   : > { %2115 = vst.msk [vmem:[#allocation3 + $0x28] sm:$0xf] %vm1850_vm8, %v2071_v23  ;;  %v2069_v16 = vpop.permute.xlu0 %2068 }
 0x1f2   : > { %2114 = vst.msk [vmem:[#allocation3 + $0x1c] sm:$0xf] %vm1850_vm8, %v2069_v16  ;;  %1828 = vrot.lane.b32.xlu1 %v4931_v57, %s4018_s10 }
 0x1f3   : > { %1826 = vrot.lane.b32.xlu0 %v4924_v58, %s4018_s10  ;;  %v3906_v58 = vld [vmem:[#allocation3 + $0x98] ss:$12 sps:$4 sm:$0xff]  }
 0x1f4   : > { %v1876_v21 = vpop.permute.xlu1 %1875  ;;  %3725 = vmatprep.mubr.msk.bf16.mxu1 %vm2552_vm7, %v3906_v58  ;;  %v3911_v58 = vld [vmem:[%s5495_s5 + $0x8] sm:$0xff]  }
 0x1f5   : > { %1921 = vst.msk [vmem:[#allocation3 + $0x24] sm:$0xf] %vm1917_vm9, %v1876_v21  ;;  %v1874_v33 = vpop.permute.xlu0 %1873  ;;  %3726 = vmatmul.mubr.msk.bf16.gmra.mxu1 %vm2552_vm7, %v3907_v46  ;;  %3729 = vmatprep.subr.bf16.mxu1 %v3911_v58 }
 0x1f6   : > { %1920 = vst.msk [vmem:[#allocation3 + $0x18] sm:$0xf] %vm1917_vm9, %v1874_v33  ;;  %2090 = vrot.lane.b32.xlu1 %v4962_v54, %s4018_s10  ;;  %3730 = vmatpush3.bf16.msra.mxu1 %v3911_v58 }
 0x1f7   : > { %2088 = vrot.lane.b32.xlu0 %v4965_v38, %s4018_s10 }
 0x1f8   : > { %v2159_v34 = vpop.permute.xlu1 %2158 }
 0x1f9   : > { %2203 = vst.msk [vmem:[#allocation3 + $0x28] sm:$0xf] %vm1917_vm9, %v2159_v34  ;;  %v2157_v35 = vpop.permute.xlu0 %2156 }
 0x1fa   : > { %2202 = vst.msk [vmem:[#allocation3 + $0x1c] sm:$0xf] %vm1917_vm9, %v2157_v35  ;;  %1895 = vrot.lane.b32.xlu1 %v4826_v63, %s4019_s23 }
 0x1fb   : > { %1893 = vrot.lane.b32.xlu0 %v4839_v2, %s4019_s23 }
 0x1fc   : > { %v1665_v57 = vpop.permute.xlu1 %1664 }
 0x1fd   : > { %1708 = vst.msk [vmem:[#allocation3 + $0x3c] sm:$0xf] %vm1702_vm2, %v1665_v57  ;;  %v1663_v36 = vpop.permute.xlu0 %1662 }
 0x1fe   : > { %1707 = vst.msk [vmem:[#allocation3 + $0x30] sm:$0xf] %vm1702_vm2, %v1663_v36  ;;  %2178 = vrot.lane.b32.xlu1 %v5019_v27, %s4019_s23 }
 0x1ff   : > { %2176 = vrot.lane.b32.xlu0 %v5039_v52, %s4019_s23  ;;  %v2129_v52 = vshrl.u32 %v5033_v48, 16 }
 0x200   : > { %v2009_v63 = vpop.permute.xlu1 %2008  ;;  %v2262_v2 = vld [vmem:[#allocation3 + $0x24] sm:$0xff] }
 0x201   : > { %2051 = vst.msk [vmem:[#allocation3 + $0x40] sm:$0xf] %vm1702_vm2, %v2009_v63  ;;  %v2007_v40 = vpop.permute.xlu0 %2006  ;;  %v2260_v56 = vld [vmem:[#allocation3 + $0x18] sm:$0xff]  ;;  %v3912_v63 = vld [vmem:[%s5495_s5] sm:$0xff]  }
 0x202   : > { %v3890_v12 = vld [vmem:[#allocation3 + $0x1c] ss:$12 sps:$4 sm:$0xff]   ;;  %2050 = vst.msk [vmem:[#allocation3 + $0x34] sm:$0xf] %vm1702_vm2, %v2007_v40  ;;  %1684 = vrot.lane.b32.xlu1 %v4979_v62, %s4017_s22  ;;  %v3392_v0 = vcombine.low %v2260_v56, %v2262_v2  ;;  %3731 = vmatprep.subr.bf16.mxu1 %v3912_v63 }
 0x203   : > { %1682 = vrot.lane.b32.xlu0 %v4994_v6, %s4017_s22  ;;  %2617 = vmatprep.mubr.bf16.mxu0 %v3890_v12  ;;  %v2131_v6 = vrot.slane %v2129_v52, 4 }
 0x204   : > { %v1813_v27 = vpop.permute.xlu1 %1812  ;;  %2618 = vmatmul.mubr.bf16.gmra.mxu0 %v3392_v0  ;;  %3732 = vmatpush3.bf16.msra.mxu1 %v3912_v63 }
 0x205   : > { %1856 = vst.msk [vmem:[#allocation3 + $0x3c] sm:$0xf] %vm1850_vm8, %v1813_v27  ;;  %v1811_v28 = vpop.permute.xlu0 %1810  ;;  %v2135_v25 = vor.u32 %v2134_v8, %v2131_v6 }
 0x206   : > { %1855 = vst.msk [vmem:[#allocation3 + $0x30] sm:$0xf] %vm1850_vm8, %v1811_v28  ;;  %2028 = vrot.lane.b32.xlu1 %v5013_v19, %s4017_s22 }
 0x207   : > { %2026 = vrot.lane.b32.xlu0 %v5009_v39, %s4017_s22  ;;  %v2136_v37 = vrot.slane %v2135_v25, 4  ;;  %s3552_s22 = sshll.u32 %s3997_s27, 4 }
 0x208   : > { %v2075_v62 = vpop.permute.xlu1 %2074 }
 0x209   : > { %2117 = vst.msk [vmem:[#allocation3 + $0x40] sm:$0xf] %vm1850_vm8, %v2075_v62  ;;  %v2073_v9 = vpop.permute.xlu0 %2072 }
 0x20a   : > { %2116 = vst.msk [vmem:[#allocation3 + $0x34] sm:$0xf] %vm1850_vm8, %v2073_v9  ;;  %1832 = vrot.lane.b32.xlu1 %v4970_v60, %s4018_s10 }
 0x20b   : > { %1830 = vrot.lane.b32.xlu0 %v4985_v4, %s4018_s10 }
 0x20c   : > { %v1880_v10 = vpop.permute.xlu1 %1879 }
 0x20d   : > { %1923 = vst.msk [vmem:[#allocation3 + $0x3c] sm:$0xf] %vm1917_vm9, %v1880_v10  ;;  %v1878_v19 = vpop.permute.xlu0 %1877 }
 0x20e   : > { %1922 = vst.msk [vmem:[#allocation3 + $0x30] sm:$0xf] %vm1917_vm9, %v1878_v19  ;;  %2094 = vrot.lane.b32.xlu1 %v5024_v45, %s4018_s10  ;;  %v2141_v45 = vsel %vm4632_vm0, %v2136_v37, %v5045_v61 }
 0x20f   : > { %2092 = vrot.lane.b32.xlu0 %v5033_v48, %s4018_s10 }
 0x210   : > { %v2163_v39 = vpop.permute.xlu1 %2162 }
 0x211   : > { %2205 = vst.msk [vmem:[#allocation3 + $0x40] sm:$0xf] %vm1917_vm9, %v2163_v39  ;;  %v2161_v60 = vpop.permute.xlu0 %2160 }
 0x212   : > { %2204 = vst.msk [vmem:[#allocation3 + $0x34] sm:$0xf] %vm1917_vm9, %v2161_v60  ;;  %1899 = vrot.lane.b32.xlu1 %v4962_v54, %s4019_s23 }
 0x213   : > { %1897 = vrot.lane.b32.xlu0 %v4965_v38, %s4019_s23 }
 0x214   : > { %v1669_v4 = vpop.permute.xlu1 %1668 }
 0x215   : > { %1710 = vst.msk [vmem:[#allocation3 + $0x54] sm:$0xf] %vm1702_vm2, %v1669_v4  ;;  %v1667_v48 = vpop.permute.xlu0 %1666 }
 0x216   : > { %1709 = vst.msk [vmem:[#allocation3 + $0x48] sm:$0xf] %vm1702_vm2, %v1667_v48  ;;  %2182 = vrot.lane.b32.xlu1 %v2151_v47, %s4019_s23 }
 0x217   : > { %2180 = vrot.lane.b32.xlu0 %v2141_v45, %s4019_s23  ;;  %s3512_s23 = sshll.u32 %s4001_s28, 5  ;;  %s3198_s28 = sshll.u32 %s4144_s13, 4  ;;  %s5431_s28 = int_to_ptr.vmem [resolvable:$true] %s3198_s28 }
 0x218   : > { %v2013_v54 = vpop.permute.xlu1 %2012  ;;  %v2266_v38 = vld [vmem:[#allocation3 + $0x3c] sm:$0xff]  ;;  %s3195_s9 = sadd.s32 %s3552_s22, %s3512_s23  ;;  %s3921_s12 = scalar_lea.vmem %s5431_s28, 1024 }
 0x219   : > { %2053 = vst.msk [vmem:[#allocation3 + $0x58] sm:$0xf] %vm1702_vm2, %v2013_v54  ;;  %v2011_v26 = vpop.permute.xlu0 %2010  ;;  %v2264_v61 = vld [vmem:[#allocation3 + $0x30] sm:$0xff]  ;;  %s3513_s27 = sshll.u32 %s3195_s9, 6  ;;  %p3922_p0 = scmp.ne.s32.totalorder %s5431_s28, %s3921_s12 }
 0x21a   : > { %v3892_v41 = vld [vmem:[#allocation3 + $0x34] ss:$12 sps:$4 sm:$0xff]   ;;  %2052 = vst.msk [vmem:[#allocation3 + $0x4c] sm:$0xf] %vm1702_vm2, %v2011_v26  ;;  %v3395_v13 = vcombine.low %v2264_v61, %v2266_v38  ;;  %s5427_s11 = scalar_lea.hbm %s5497_s7, %s3513_s27  ;;  %s3925_s22 = sshll.u32 %s4021_s18, 4  ;;  %s3926_s22 = int_to_ptr.vmem [resolvable:$false] %s3925_s22 }
 0x21b   : > { %2625 = vmatprep.mubr.bf16.mxu0 %v3892_v41  ;;  %p3923_p1 = pnand %p3922_p0, %p4114_p3  ;;  %s3927_s23 = scalar_lea.vmem %s3926_s22, 2048 }
 0x21c   : > { %v1817_v49 = vpop.permute.xlu1 %1816  ;;  %2626 = vmatmul.mubr.bf16.gmra.mxu0 %v3395_v13  ;;  %p3928_p4 = scmp.lt.s32.totalorder %s5431_s28, %s3926_s22  ;;  %p3929_p5 = scmp.lt.s32.totalorder %s3927_s23, %s3921_s12 }
 0x21d   : > { %1858 = vst.msk [vmem:[#allocation3 + $0x54] sm:$0xf] %vm1850_vm8, %v1817_v49  ;;  %v1815_v51 = vpop.permute.xlu0 %1814  ;;  %p3924_p2 = pneg %p3923_p1 }
 0x21e   : > { %1857 = vst.msk [vmem:[#allocation3 + $0x48] sm:$0xf] %vm1850_vm8, %v1815_v51  ;;  %p3930_p6 = por %p3929_p5, %p3928_p4 }
 0x220   : > { %v2079_v14 = vpop.permute.xlu1 %2078  ;;  %p3931_p7 = pnand %p3930_p6, %p3924_p2 }
 0x221   : > { %2119 = vst.msk [vmem:[#allocation3 + $0x58] sm:$0xf] %vm1850_vm8, %v2079_v14  ;;  %v2077_v18 = vpop.permute.xlu0 %2076 }
 0x222   : > { %2118 = vst.msk [vmem:[#allocation3 + $0x4c] sm:$0xf] %vm1850_vm8, %v2077_v18 }
 0x224   : > { %v1884_v47 = vpop.permute.xlu1 %1883 }
 0x225   : > { %1925 = vst.msk [vmem:[#allocation3 + $0x54] sm:$0xf] %vm1917_vm9, %v1884_v47  ;;  %v1882_v50 = vpop.permute.xlu0 %1881 }
 0x226   : > { %1924 = vst.msk [vmem:[#allocation3 + $0x48] sm:$0xf] %vm1917_vm9, %v1882_v50 }
 0x228   : > { %v2167_v59 = vpop.permute.xlu1 %2166 }
 0x229   : > { %2207 = vst.msk [vmem:[#allocation3 + $0x58] sm:$0xf] %vm1917_vm9, %v2167_v59  ;;  %v2165_v1 = vpop.permute.xlu0 %2164 }
 0x22a   : > { %2206 = vst.msk [vmem:[#allocation3 + $0x4c] sm:$0xf] %vm1917_vm9, %v2165_v1 }
 0x22c   : > { %v1673_v7 = vpop.permute.xlu1 %1672 }
 0x22d   : > { %1712 = vst.msk [vmem:[#allocation3 + $0x6c] sm:$0xf] %vm1702_vm2, %v1673_v7  ;;  %v1671_v15 = vpop.permute.xlu0 %1670 }
 0x22e   : > { %1711 = vst.msk [vmem:[#allocation3 + $0x60] sm:$0xf] %vm1702_vm2, %v1671_v15 }
 0x230   : > { %v2017_v17 = vpop.permute.xlu1 %2016  ;;  %v2270_v20 = vld [vmem:[#allocation3 + $0x54] sm:$0xff] }
 0x231   : > { %2055 = vst.msk [vmem:[#allocation3 + $0x70] sm:$0xf] %vm1702_vm2, %v2017_v17  ;;  %v2015_v22 = vpop.permute.xlu0 %2014  ;;  %v2268_v44 = vld [vmem:[#allocation3 + $0x48] sm:$0xff] }
 0x232   : > { %v3896_v55 = vld [vmem:[#allocation3 + $0x4c] ss:$12 sps:$4 sm:$0xff]   ;;  %2054 = vst.msk [vmem:[#allocation3 + $0x64] sm:$0xf] %vm1702_vm2, %v2015_v22  ;;  %v3398_v53 = vcombine.low %v2268_v44, %v2270_v20 }
 0x233   : > { %2633 = vmatprep.mubr.bf16.mxu0 %v3896_v55 }
 0x234   : > { %v1821_v3 = vpop.permute.xlu1 %1820  ;;  %2634 = vmatmul.mubr.bf16.gmra.mxu0 %v3398_v53 }
 0x235   : > { %1860 = vst.msk [vmem:[#allocation3 + $0x6c] sm:$0xf] %vm1850_vm8, %v1821_v3  ;;  %v1819_v11 = vpop.permute.xlu0 %1818 }
 0x236   : > { %1859 = vst.msk [vmem:[#allocation3 + $0x60] sm:$0xf] %vm1850_vm8, %v1819_v11 }
 0x238   : > { %v2083_v32 = vpop.permute.xlu1 %2082 }
 0x239   : > { %2121 = vst.msk [vmem:[#allocation3 + $0x70] sm:$0xf] %vm1850_vm8, %v2083_v32  ;;  %v2081_v29 = vpop.permute.xlu0 %2080 }
 0x23a   : > { %2120 = vst.msk [vmem:[#allocation3 + $0x64] sm:$0xf] %vm1850_vm8, %v2081_v29 }
 0x23c   : > { %v1888_v43 = vpop.permute.xlu1 %1887 }
 0x23d   : > { %1927 = vst.msk [vmem:[#allocation3 + $0x6c] sm:$0xf] %vm1917_vm9, %v1888_v43  ;;  %v1886_v24 = vpop.permute.xlu0 %1885  ;;  %v5318_v43 = vld [vmem:[%s5494_s4] ss:$0 sm:$0xff] }
 0x23e   : > { %1926 = vst.msk [vmem:[#allocation3 + $0x60] sm:$0xf] %vm1917_vm9, %v1886_v24 }
 0x240   : > { %v2171_v42 = vpop.permute.xlu1 %2170 }
 0x241   : > { %2209 = vst.msk [vmem:[#allocation3 + $0x70] sm:$0xf] %vm1917_vm9, %v2171_v42  ;;  %v2169_v30 = vpop.permute.xlu0 %2168  ;;  %v3715_v22 = vpop.f32.mrf.mxu1 }
 0x242   : > { %2208 = vst.msk [vmem:[#allocation3 + $0x64] sm:$0xf] %vm1917_vm9, %v2169_v30 }
 0x243   : > { %v2708_v44 = vpop.f32.mrf.mxu1 }
 0x244   : > { %v1677_v31 = vpop.permute.xlu1 %1676 }
 0x245   : > { %1714 = vst.msk [vmem:[#allocation3 + $0x84] sm:$0xf] %vm1702_vm2, %v1677_v31  ;;  %v1675_v23 = vpop.permute.xlu0 %1674  ;;  %v3716_v3 = vpop.f32.mrf.mxu1 }
 0x246   : > { %1713 = vst.msk [vmem:[#allocation3 + $0x78] sm:$0xf] %vm1702_vm2, %v1675_v23  ;;  %v4020_v23 = vmov 0.0  }
 0x247   : > { %v2711_v42 = vpop.f32.mrf.mxu1 }
 0x248   : > { %v2021_v16 = vpop.permute.xlu1 %2020  ;;  %v2274_v21 = vld [vmem:[#allocation3 + $0x6c] sm:$0xff] }
 0x249   : > { %2057 = vst.msk [vmem:[#allocation3 + $0x88] sm:$0xf] %vm1702_vm2, %v2021_v16  ;;  %v2019_v33 = vpop.permute.xlu0 %2018  ;;  %v2272_v34 = vld [vmem:[#allocation3 + $0x60] sm:$0xff] }
 0x24a   : > { %v3898_v35 = vld [vmem:[#allocation3 + $0x64] ss:$12 sps:$4 sm:$0xff]   ;;  %2056 = vst.msk [vmem:[#allocation3 + $0x7c] sm:$0xf] %vm1702_vm2, %v2019_v33  ;;  %v3401_v57 = vcombine.low %v2272_v34, %v2274_v21 }
 0x24b   : > { %2641 = vmatprep.mubr.bf16.mxu0 %v3898_v35 }
 0x24c   : > { %v1825_v46 = vpop.permute.xlu1 %1824  ;;  %2642 = vmatmul.mubr.bf16.gmra.mxu0 %v3401_v57 }
 0x24d   : > { %1862 = vst.msk [vmem:[#allocation3 + $0x84] sm:$0xf] %vm1850_vm8, %v1825_v46  ;;  %v1823_v36 = vpop.permute.xlu0 %1822 }
 0x24e   : > { %1861 = vst.msk [vmem:[#allocation3 + $0x78] sm:$0xf] %vm1850_vm8, %v1823_v36 }
 0x250   : > { %v2087_v2 = vpop.permute.xlu1 %2086 }
 0x251   : > { %2123 = vst.msk [vmem:[#allocation3 + $0x88] sm:$0xf] %vm1850_vm8, %v2087_v2  ;;  %v2085_v40 = vpop.permute.xlu0 %2084 }
 0x252   : > { %2122 = vst.msk [vmem:[#allocation3 + $0x7c] sm:$0xf] %vm1850_vm8, %v2085_v40 }
 0x254   : > { %v1892_v56 = vpop.permute.xlu1 %1891 }
 0x255   : > { %1929 = vst.msk [vmem:[#allocation3 + $0x84] sm:$0xf] %vm1917_vm9, %v1892_v56  ;;  %v1890_v12 = vpop.permute.xlu0 %1889 }
 0x256   : > { %1928 = vst.msk [vmem:[#allocation3 + $0x78] sm:$0xf] %vm1917_vm9, %v1890_v12 }
 0x258   : > { %v2175_v0 = vpop.permute.xlu1 %2174 }
 0x259   : > { %2211 = vst.msk [vmem:[#allocation3 + $0x88] sm:$0xf] %vm1917_vm9, %v2175_v0  ;;  %v2173_v27 = vpop.permute.xlu0 %2172  ;;  %v3719_v0 = vpop.f32.mrf.mxu1 }
 0x25a   : > { %2210 = vst.msk [vmem:[#allocation3 + $0x7c] sm:$0xf] %vm1917_vm9, %v2173_v27 }
 0x25b   : > { %v2724_v27 = vpop.f32.mrf.mxu1 }
 0x25c   : > { %v1681_v52 = vpop.permute.xlu1 %1680 }
 0x25d   : > { %1716 = vst.msk [vmem:[#allocation3 + $0x9c] sm:$0xf] %vm1702_vm2, %v1681_v52  ;;  %v1679_v5 = vpop.permute.xlu0 %1678 }
 0x25e   : > { %1715 = vst.msk [vmem:[#allocation3 + $0x90] sm:$0xf] %vm1702_vm2, %v1679_v5 }
 0x260   : > { %v2025_v28 = vpop.permute.xlu1 %2024  ;;  %v2278_v62 = vld [vmem:[#allocation3 + $0x84] sm:$0xff] }
 0x261   : > { %2059 = vst.msk [vmem:[#allocation3 + $0xa0] sm:$0xf] %vm1702_vm2, %v2025_v28  ;;  %v2023_v6 = vpop.permute.xlu0 %2022  ;;  %v2276_v8 = vld [vmem:[#allocation3 + $0x78] sm:$0xff]  ;;  %v3720_v28 = vpop.f32.mrf.mxu1 }
 0x262   : > { %v3902_v9 = vld [vmem:[#allocation3 + $0x7c] ss:$12 sps:$4 sm:$0xff]   ;;  %2058 = vst.msk [vmem:[#allocation3 + $0x94] sm:$0xf] %vm1702_vm2, %v2023_v6  ;;  %v3404_v10 = vcombine.low %v2276_v8, %v2278_v62 }
 0x263   : > { %2649 = vmatprep.mubr.bf16.mxu0 %v3902_v9 }
 0x264   : > { %v1829_v25 = vpop.permute.xlu1 %1828  ;;  %2650 = vmatmul.mubr.bf16.gmra.mxu0 %v3404_v10  ;;  %v2727_v10 = vpop.f32.mrf.mxu1 }
 0x265   : > { %1864 = vst.msk [vmem:[#allocation3 + $0x9c] sm:$0xf] %vm1850_vm8, %v1829_v25  ;;  %v1827_v19 = vpop.permute.xlu0 %1826 }
 0x266   : > { %1863 = vst.msk [vmem:[#allocation3 + $0x90] sm:$0xf] %vm1850_vm8, %v1827_v19 }
 0x268   : > { %v2091_v39 = vpop.permute.xlu1 %2090 }
 0x269   : > { %2125 = vst.msk [vmem:[#allocation3 + $0xa0] sm:$0xf] %vm1850_vm8, %v2091_v39  ;;  %v2089_v37 = vpop.permute.xlu0 %2088 }
 0x26a   : > { %2124 = vst.msk [vmem:[#allocation3 + $0x94] sm:$0xf] %vm1850_vm8, %v2089_v37 }
 0x26c   : > { %v1896_v60 = vpop.permute.xlu1 %1895 }
 0x26d   : > { %1931 = vst.msk [vmem:[#allocation3 + $0x9c] sm:$0xf] %vm1917_vm9, %v1896_v60  ;;  %v1894_v4 = vpop.permute.xlu0 %1893 }
 0x26e   : > { %1930 = vst.msk [vmem:[#allocation3 + $0x90] sm:$0xf] %vm1917_vm9, %v1894_v4 }
 0x270   : > { %v2179_v45 = vpop.permute.xlu1 %2178 }
 0x271   : > { %2213 = vst.msk [vmem:[#allocation3 + $0xa0] sm:$0xf] %vm1917_vm9, %v2179_v45  ;;  %v2177_v48 = vpop.permute.xlu0 %2176 }
 0x272   : > { %2212 = vst.msk [vmem:[#allocation3 + $0x94] sm:$0xf] %vm1917_vm9, %v2177_v48 }
 0x274   : > { %v1685_v54 = vpop.permute.xlu1 %1684 }
 0x275   : > { %1718 = vst.msk [vmem:[#allocation3 + $0xb4] sm:$0xf] %vm1702_vm2, %v1685_v54  ;;  %v1683_v38 = vpop.permute.xlu0 %1682 }
 0x276   : > { %1717 = vst.msk [vmem:[#allocation3 + $0xa8] sm:$0xf] %vm1702_vm2, %v1683_v38 }
 0x278   : > { %v2029_v26 = vpop.permute.xlu1 %2028  ;;  %v2282_v61 = vld [vmem:[#allocation3 + $0x9c] sm:$0xff] }
 0x279   : > { %2061 = vst.msk [vmem:[#allocation3 + $0xb8] sm:$0xf] %vm1702_vm2, %v2029_v26  ;;  %v2027_v41 = vpop.permute.xlu0 %2026  ;;  %v2280_v13 = vld [vmem:[#allocation3 + $0x90] sm:$0xff] }
 0x27a   : > { %v3904_v49 = vld [vmem:[#allocation3 + $0x94] ss:$12 sps:$4 sm:$0xff]   ;;  %2060 = vst.msk [vmem:[#allocation3 + $0xac] sm:$0xf] %vm1702_vm2, %v2027_v41  ;;  %v3407_v51 = vcombine.low %v2280_v13, %v2282_v61 }
 0x27b   : > { %2657 = vmatprep.mubr.bf16.mxu0 %v3904_v49 }
 0x27c   : > { %v1833_v14 = vpop.permute.xlu1 %1832  ;;  %2658 = vmatmul.mubr.bf16.gmra.mxu0 %v3407_v51 }
 0x27d   : > { %1866 = vst.msk [vmem:[#allocation3 + $0xb4] sm:$0xf] %vm1850_vm8, %v1833_v14  ;;  %v1831_v18 = vpop.permute.xlu0 %1830  ;;  %v3723_v14 = vpop.f32.mrf.mxu1 }
 0x27e   : > { %1865 = vst.msk [vmem:[#allocation3 + $0xa8] sm:$0xf] %vm1850_vm8, %v1831_v18 }
 0x27f   : > { %v2740_v18 = vpop.f32.mrf.mxu1 }
 0x280   : > { %v2095_v47 = vpop.permute.xlu1 %2094 }
 0x281   : > { %2127 = vst.msk [vmem:[#allocation3 + $0xb8] sm:$0xf] %vm1850_vm8, %v2095_v47  ;;  %v2093_v50 = vpop.permute.xlu0 %2092 }
 0x282   : > { %2126 = vst.msk [vmem:[#allocation3 + $0xac] sm:$0xf] %vm1850_vm8, %v2093_v50 }
 0x284   : > { %v1900_v59 = vpop.permute.xlu1 %1899 }
 0x285   : > { %1933 = vst.msk [vmem:[#allocation3 + $0xb4] sm:$0xf] %vm1917_vm9, %v1900_v59  ;;  %v1898_v1 = vpop.permute.xlu0 %1897  ;;  %v3724_v59 = vpop.f32.mrf.mxu1 }
 0x286   : > { %1932 = vst.msk [vmem:[#allocation3 + $0xa8] sm:$0xf] %vm1917_vm9, %v1898_v1 }
 0x288   : > { %v2183_v7 = vpop.permute.xlu1 %2182 }
 0x289   : > { %2215 = vst.msk [vmem:[#allocation3 + $0xb8] sm:$0xf] %vm1917_vm9, %v2183_v7  ;;  %v2181_v15 = vpop.permute.xlu0 %2180 }
 0x28a   : > { %2214 = vst.msk [vmem:[#allocation3 + $0xac] sm:$0xf] %vm1917_vm9, %v2181_v15 }
 0x28d   : > { %v3910_v20 = vld [vmem:[#allocation3 + $0xa8] ss:$12 sps:$4 sm:$0xff]  }
 0x291   : > { %v3908_v17 = vld [vmem:[#allocation3 + $0xac] ss:$12 sps:$4 sm:$0xff]  }
 0x292   : > { %2665 = vmatprep.mubr.bf16.mxu0 %v3908_v17 }
 0x293   : > { %2666 = vmatmul.mubr.bf16.gmra.mxu0 %v3910_v20  ;;  %v2743_v20 = vpop.f32.mrf.mxu1 }
 0x2ab   : > { %v3593_v55 = vpop.f32.mrf.mxu0 }
 0x2ad   : > { %v3594_v53 = vpop.f32.mrf.mxu0 }
 0x2ae   : > { %v3595_v11 = vadd.f32 %v3594_v53, %v3593_v55 }
 0x2af   : > { %v3596_v32 = vpop.f32.mrf.mxu0 }
 0x2b0   : > { %v2709_v29 = vadd.f32 %v3595_v11, %v2708_v44 }
 0x2b1   : > { %v3597_v24 = vpop.f32.mrf.mxu0 }
 0x2b2   : > { %v3598_v30 = vadd.f32 %v3597_v24, %v3596_v32  ;;  %vm2778_vm10 = vcmp.ge.f32.partialorder %v2709_v29, %v5318_v43 }
 0x2b3   : > { %v3440_v16 = vsel %vm2778_vm10, 1.0, %v4020_v23 }
 0x2b4   : > { %v2712_v31 = vadd.f32 %v3598_v30, %v2711_v42 }
 0x2b6   : > { %vm2779_vm11 = vcmp.ge.f32.partialorder %v2712_v31, %v5318_v43 }
 0x2b7   : > { %v3441_v21 = vsel %vm2779_vm11, 1.0, %v4020_v23 }
 0x2b8   : > { %v2826_v33 = vpack.c.bf16 %v3441_v21, %v3440_v16 }
 0x2ba   : > { %3733 = vmatprep.mubr.msk.bf16.mxu1 %vm2552_vm7, %v2826_v33 }
 0x2c4   : > { %v3599_v34 = vpop.f32.mrf.mxu0 }
 0x2c6   : > { %v3600_v35 = vpop.f32.mrf.mxu0 }
 0x2c7   : > { %v3601_v58 = vadd.f32 %v3600_v35, %v3599_v34  ;;  %v3727_v35 = vpop.f32.mrf.mxu1 }
 0x2c8   : > { %v3602_v57 = vpop.f32.mrf.mxu0 }
 0x2c9   : > { %v2717_v46 = vadd.f32 %v3715_v22, %v3601_v58  ;;  %v2756_v58 = vpop.f32.mrf.mxu1 }
 0x2ca   : > { %v3603_v36 = vpop.f32.mrf.mxu0 }
 0x2cb   : > { %v3604_v63 = vadd.f32 %v3603_v36, %v3602_v57  ;;  %vm2780_vm12 = vcmp.ge.f32.partialorder %v2717_v46, %v5318_v43  ;;  %v3728_v36 = vpop.f32.mrf.mxu1 }
 0x2cc   : > { %v3442_v40 = vsel %vm2780_vm12, 1.0, %v4020_v23 }
 0x2cd   : > { %v2720_v2 = vadd.f32 %v3716_v3, %v3604_v63 }
 0x2cf   : > { %vm2781_vm14 = vcmp.ge.f32.partialorder %v2720_v2, %v5318_v43 }
 0x2d0   : > { %v3443_v56 = vsel %vm2781_vm14, 1.0, %v4020_v23 }
 0x2d1   : > { %v2827_v12 = vpack.c.bf16 %v3443_v56, %v3442_v40 }
 0x2d3   : > { %3734 = vmatmul.mubr.msk.bf16.vlgmr.msra.gmra.mxu1 %vm2552_vm7, %v2827_v12  ;;  %v2759_v12 = vpop.f32.mrf.mxu1 }
 0x2dc   : > { %v3605_v52 = vpop.f32.mrf.mxu0 }
 0x2de   : > { %v3606_v5 = vpop.f32.mrf.mxu0 }
 0x2df   : > { %v3607_v62 = vadd.f32 %v3606_v5, %v3605_v52 }
 0x2e0   : > { %v3608_v6 = vpop.f32.mrf.mxu0 }
 0x2e1   : > { %v2725_v8 = vadd.f32 %v3607_v62, %v2724_v27 }
 0x2e2   : > { %v3609_v9 = vpop.f32.mrf.mxu0 }
 0x2e3   : > { %v3610_v25 = vadd.f32 %v3609_v9, %v3608_v6  ;;  %vm2782_vm15 = vcmp.ge.f32.partialorder %v2725_v8, %v5318_v43 }
 0x2e4   : > { %v3444_v39 = vsel %vm2782_vm15, 1.0, %v4020_v23 }
 0x2e5   : > { %v2728_v19 = vadd.f32 %v3610_v25, %v2727_v10 }
 0x2e7   : > { %vm2783_vm13 = vcmp.ge.f32.partialorder %v2728_v19, %v5318_v43 }
 0x2e8   : > { %v3445_v37 = vsel %vm2783_vm13, 1.0, %v4020_v23 }
 0x2e9   : > { %v2828_v60 = vpack.c.bf16 %v3445_v37, %v3444_v39 }
 0x2eb   : > { %3737 = vmatprep.mubr.msk.bf16.mxu1 %vm2552_vm7, %v2828_v60 }
 0x2f4   : > { %v3611_v4 = vpop.f32.mrf.mxu0 }
 0x2f6   : > { %v3612_v45 = vpop.f32.mrf.mxu0 }
 0x2f7   : > { %v3613_v48 = vadd.f32 %v3612_v45, %v3611_v4 }
 0x2f8   : > { %v3614_v54 = vpop.f32.mrf.mxu0 }
 0x2f9   : > { %v2733_v38 = vadd.f32 %v3719_v0, %v3613_v48  ;;  %v5367_v48 = vld [vmem:[%s5496_s6] ss:$0 sm:$0xff] }
 0x2fa   : > { %v3615_v26 = vpop.f32.mrf.mxu0 }
 0x2fb   : > { %v3616_v61 = vadd.f32 %v3615_v26, %v3614_v54  ;;  %vm2784_vm4 = vcmp.ge.f32.partialorder %v2733_v38, %v5318_v43 }
 0x2fc   : > { %v3446_v13 = vsel %vm2784_vm4, 1.0, %v4020_v23 }
 0x2fd   : > { %v2736_v41 = vadd.f32 %v3720_v28, %v3616_v61 }
 0x2ff   : > { %vm2785_vm5 = vcmp.ge.f32.partialorder %v2736_v41, %v5318_v43 }
 0x300   : > { %v3447_v49 = vsel %vm2785_vm5, 1.0, %v4020_v23 }
 0x301   : > { %v2829_v51 = vpack.c.bf16 %v3447_v49, %v3446_v13  ;;  %v3914_v49 = vld [vmem:[%s5346_s21] sm:$0xff]  }
 0x303   : > { %3738 = vmatmul.mubr.msk.bf16.gmra.mxu1 %vm2552_vm7, %v2829_v51 }
 0x30c   : > { %v3617_v47 = vpop.f32.mrf.mxu0 }
 0x30e   : > { %v3618_v50 = vpop.f32.mrf.mxu0 }
 0x30f   : > { %v3619_v1 = vadd.f32 %v3618_v50, %v3617_v47 }
 0x310   : > { %v3620_v7 = vpop.f32.mrf.mxu0 }
 0x311   : > { %v2741_v15 = vadd.f32 %v3619_v1, %v2740_v18 }
 0x312   : > { %v3621_v17 = vpop.f32.mrf.mxu0 }
 0x313   : > { %v3622_v22 = vadd.f32 %v3621_v17, %v3620_v7  ;;  %vm2786_vm6 = vcmp.ge.f32.partialorder %v2741_v15, %v5318_v43 }
 0x314   : > { %v3448_v55 = vsel %vm2786_vm6, 1.0, %v4020_v23 }
 0x315   : > { %v2744_v44 = vadd.f32 %v3622_v22, %v2743_v20 }
 0x317   : > { %vm2787_vm1 = vcmp.ge.f32.partialorder %v2744_v44, %v5318_v43  ;;  %v3915_v44 = vld [vmem:[%s5346_s21 + $0x18] sm:$0xff]  }
 0x318   : > { %v3449_v53 = vsel %vm2787_vm1, 1.0, %v4020_v23 }
 0x319   : > { %v2830_v3 = vpack.c.bf16 %v3449_v53, %v3448_v55 }
 0x31b   : > { %3741 = vmatprep.mubr.msk.bf16.mxu1 %vm2552_vm7, %v2830_v3 }
 0x324   : > { %v3623_v11 = vpop.f32.mrf.mxu0 }
 0x326   : > { %v3624_v32 = vpop.f32.mrf.mxu0 }
 0x327   : > { %v3625_v29 = vadd.f32 %v3624_v32, %v3623_v11  ;;  %v3916_v32 = vld [vmem:[%s5346_s21 + $0x10] sm:$0xff]  }
 0x328   : > { %v3626_v24 = vpop.f32.mrf.mxu0 }
 0x329   : > { %v2749_v42 = vadd.f32 %v3723_v14, %v3625_v29 }
 0x32a   : > { %v3627_v30 = vpop.f32.mrf.mxu0 }
 0x32b   : > { %v3628_v31 = vadd.f32 %v3627_v30, %v3626_v24  ;;  %vm2788_vm3 = vcmp.ge.f32.partialorder %v2749_v42, %v5318_v43 }
 0x32c   : > { %v3450_v21 = vsel %vm2788_vm3, 1.0, %v4020_v23 }
 0x32d   : > { %v2752_v16 = vadd.f32 %v3724_v59, %v3628_v31 }
 0x32f   : > { %vm2789_vm0 = vcmp.ge.f32.partialorder %v2752_v16, %v5318_v43 }
 0x330   : > { %v3451_v33 = vsel %vm2789_vm0, 1.0, %v4020_v23 }
 0x331   : > { %v2831_v34 = vpack.c.bf16 %v3451_v33, %v3450_v21 }
 0x333   : > { %3742 = vmatmul.mubr.msk.bf16.gmra.mxu1 %vm2552_vm7, %v2831_v34 }
 0x33c   : > { %v3629_v57 = vpop.f32.mrf.mxu0 }
 0x33e   : > { %v3630_v46 = vpop.f32.mrf.mxu0 }
 0x33f   : > { %v3631_v63 = vadd.f32 %v3630_v46, %v3629_v57  ;;  %v3917_v46 = vld [vmem:[%s5346_s21 + $0x28] sm:$0xff]  }
 0x340   : > { %v3632_v2 = vpop.f32.mrf.mxu0 }
 0x341   : > { %v2757_v40 = vadd.f32 %v3631_v63, %v2756_v58 }
 0x342   : > { %v3633_v56 = vpop.f32.mrf.mxu0 }
 0x343   : > { %v3634_v0 = vadd.f32 %v3633_v56, %v3632_v2  ;;  %vm2790_vm2 = vcmp.ge.f32.partialorder %v2757_v40, %v5318_v43  ;;  %v3918_v56 = vld [vmem:[%s5346_s21 + $0x20] sm:$0xff]  }
 0x344   : > { %v3452_v52 = vsel %vm2790_vm2, 1.0, %v4020_v23 }
 0x345   : > { %v2760_v27 = vadd.f32 %v3634_v0, %v2759_v12 }
 0x347   : > { %vm2791_vm8 = vcmp.ge.f32.partialorder %v2760_v27, %v5318_v43 }
 0x348   : > { %v3453_v5 = vsel %vm2791_vm8, 1.0, %v4020_v23 }
 0x349   : > { %v2832_v28 = vpack.c.bf16 %v3453_v5, %v3452_v52 }
 0x34b   : > { %3745 = vmatprep.mubr.msk.bf16.mxu1 %vm2552_vm7, %v2832_v28 }
 0x353   : > { %v3635_v62 = vpop.f32.mrf.mxu0 }
 0x355   : > { %v3636_v6 = vpop.f32.mrf.mxu0 }
 0x356   : > { %v3637_v8 = vadd.f32 %v3636_v6, %v3635_v62 }
 0x357   : > { %v3638_v9 = vpop.f32.mrf.mxu0 }
 0x358   : > { %v2765_v10 = vadd.f32 %v3727_v35, %v3637_v8 }
 0x359   : > { %v3639_v25 = vpop.f32.mrf.mxu0 }
 0x35a   : > { %v3640_v19 = vadd.f32 %v3639_v25, %v3638_v9  ;;  %vm2792_vm9 = vcmp.ge.f32.partialorder %v2765_v10, %v5318_v43 }
 0x35b   : > { %v3454_v37 = vsel %vm2792_vm9, 1.0, %v4020_v23 }
 0x35c   : > { %v2768_v39 = vadd.f32 %v3728_v36, %v3640_v19  ;;  %v3919_v19 = vld [vmem:[%s5346_s21 + $0x38] sm:$0xff]  }
 0x35e   : > { %vm2793_vm10 = vcmp.ge.f32.partialorder %v2768_v39, %v5318_v43  ;;  %v3913_v43 = vld [vmem:[%s5346_s21 + $0x8] sm:$0xff]  }
 0x35f   : > { %v3455_v60 = vsel %vm2793_vm10, 1.0, %v4020_v23 }
 0x360   : > { %v2833_v4 = vpack.c.bf16 %v3455_v60, %v3454_v37 }
 0x362   : > { %3746 = vmatmul.mubr.msk.bf16.gmra.mxu1 %vm2552_vm7, %v2833_v4 }
 0x393   : > { %v3735_v45 = vpop.f32.mrf.mxu1 }
 0x394   : > { %vm2980_vm11 = vcmp.ge.f32.partialorder %v3735_v45, %v5367_v48  ;;  %v3920_v45 = vld [vmem:[%s5346_s21 + $0x30] sm:$0xff]   ;;  %s5437_s21 = scalar_lea.sflag [#allocation5], %s283_s20 }
 0x395   : > { %v2908_v54 = vpop.f32.mrf.mxu1  ;;  %v3469_v26 = vsel %vm2980_vm11, 1.0, %v4020_v23 }
 0x396   : > { %vm2978_vm12 = vcmp.ge.f32.partialorder %v2908_v54, %v5367_v48 }
 0x397   : > { %v3736_v38 = vpop.f32.mrf.mxu1  ;;  %v3467_v51 = vsel %vm2978_vm12, 1.0, %v4020_v23 }
 0x398   : > { %vm2981_vm14 = vcmp.ge.f32.partialorder %v3736_v38, %v5367_v48 }
 0x399   : > { %v3470_v61 = vsel %vm2981_vm14, 1.0, %v4020_v23  ;;  %v2911_v41 = vpop.f32.mrf.mxu1 }
 0x39a   : > { %v3027_v13 = vpack.c.bf16 %v3470_v61, %v3469_v26  ;;  %vm2979_vm7 = vcmp.ge.f32.partialorder %v2911_v41, %v5367_v48 }
 0x39b   : > { %v3468_v14 = vsel %vm2979_vm7, 1.0, %v4020_v23 }
 0x39c   : > { %v3102_v18 = vadd.bf16 %v3913_v43, %v3027_v13  ;;  %v3026_v47 = vpack.c.bf16 %v3468_v14, %v3467_v51 }
 0x39e   : > { %v3495_v50 = vcombine.low %v3102_v18, %v3102_v18  ;;  %v3496_v59 = vcombine.high %v3102_v18, %v3102_v18  ;;  %v3101_v1 = vadd.bf16 %v3914_v49, %v3026_v47 }
 0x3a0   : > { %3167 = vst [vmem:[%s4144_s13 + $0x8] sm:$0xf] %v3495_v50  ;;  %3168 = vst [vmem:[%s4144_s13 + $0xc] sm:$0xf] %v3496_v59  ;;  %v3493_v7 = vcombine.low %v3101_v1, %v3101_v1  ;;  %v3494_v15 = vcombine.high %v3101_v1, %v3101_v1 }
 0x3a2   : > { %3165 = vst [vmem:[%s4144_s13] sm:$0xf] %v3493_v7  ;;  %3166 = vst [vmem:[%s4144_s13 + $0x4] sm:$0xf] %v3494_v15 }
 0x3c3   : > { %v3739_v17 = vpop.f32.mrf.mxu1 }
 0x3c4   : > { %vm2984_vm15 = vcmp.ge.f32.partialorder %v3739_v17, %v5367_v48 }
 0x3c5   : > { %v2924_v20 = vpop.f32.mrf.mxu1  ;;  %v3473_v55 = vsel %vm2984_vm15, 1.0, %v4020_v23 }
 0x3c6   : > { %vm2982_vm13 = vcmp.ge.f32.partialorder %v2924_v20, %v5367_v48 }
 0x3c7   : > { %v3740_v22 = vpop.f32.mrf.mxu1  ;;  %v3471_v29 = vsel %vm2982_vm13, 1.0, %v4020_v23 }
 0x3c8   : > { %vm2985_vm4 = vcmp.ge.f32.partialorder %v3740_v22, %v5367_v48 }
 0x3c9   : > { %v3474_v53 = vsel %vm2985_vm4, 1.0, %v4020_v23  ;;  %v2927_v3 = vpop.f32.mrf.mxu1 }
 0x3ca   : > { %v3029_v11 = vpack.c.bf16 %v3474_v53, %v3473_v55  ;;  %vm2983_vm5 = vcmp.ge.f32.partialorder %v2927_v3, %v5367_v48 }
 0x3cb   : > { %v3472_v24 = vsel %vm2983_vm5, 1.0, %v4020_v23 }
 0x3cc   : > { %v3104_v42 = vadd.bf16 %v3915_v44, %v3029_v11  ;;  %v3028_v30 = vpack.c.bf16 %v3472_v24, %v3471_v29 }
 0x3ce   : > { %v3499_v31 = vcombine.low %v3104_v42, %v3104_v42  ;;  %v3500_v16 = vcombine.high %v3104_v42, %v3104_v42  ;;  %v3103_v21 = vadd.bf16 %v3916_v32, %v3028_v30 }
 0x3d0   : > { %3171 = vst [vmem:[%s4144_s13 + $0x18] sm:$0xf] %v3499_v31  ;;  %3172 = vst [vmem:[%s4144_s13 + $0x1c] sm:$0xf] %v3500_v16  ;;  %v3497_v33 = vcombine.low %v3103_v21, %v3103_v21  ;;  %v3498_v34 = vcombine.high %v3103_v21, %v3103_v21 }
 0x3d2   : > { %3169 = vst [vmem:[%s4144_s13 + $0x10] sm:$0xf] %v3497_v33  ;;  %3170 = vst [vmem:[%s4144_s13 + $0x14] sm:$0xf] %v3498_v34 }
 0x3f3   : > { %v3743_v35 = vpop.f32.mrf.mxu1 }
 0x3f4   : > { %vm2988_vm6 = vcmp.ge.f32.partialorder %v3743_v35, %v5367_v48 }
 0x3f5   : > { %v2940_v58 = vpop.f32.mrf.mxu1  ;;  %v3477_v36 = vsel %vm2988_vm6, 1.0, %v4020_v23 }
 0x3f6   : > { %vm2986_vm1 = vcmp.ge.f32.partialorder %v2940_v58, %v5367_v48 }
 0x3f7   : > { %v3744_v57 = vpop.f32.mrf.mxu1  ;;  %v3475_v12 = vsel %vm2986_vm1, 1.0, %v4020_v23 }
 0x3f8   : > { %vm2989_vm3 = vcmp.ge.f32.partialorder %v3744_v57, %v5367_v48 }
 0x3f9   : > { %v3478_v63 = vsel %vm2989_vm3, 1.0, %v4020_v23  ;;  %v2943_v2 = vpop.f32.mrf.mxu1 }
 0x3fa   : > { %v3031_v40 = vpack.c.bf16 %v3478_v63, %v3477_v36  ;;  %vm2987_vm0 = vcmp.ge.f32.partialorder %v2943_v2, %v5367_v48 }
 0x3fb   : > { %v3476_v0 = vsel %vm2987_vm0, 1.0, %v4020_v23 }
 0x3fc   : > { %v3106_v27 = vadd.bf16 %v3917_v46, %v3031_v40  ;;  %v3030_v52 = vpack.c.bf16 %v3476_v0, %v3475_v12 }
 0x3fe   : > { %v3503_v5 = vcombine.low %v3106_v27, %v3106_v27  ;;  %v3504_v28 = vcombine.high %v3106_v27, %v3106_v27  ;;  %v3105_v62 = vadd.bf16 %v3918_v56, %v3030_v52 }
 0x400   : > { %3175 = vst [vmem:[%s4144_s13 + $0x28] sm:$0xf] %v3503_v5  ;;  %3176 = vst [vmem:[%s4144_s13 + $0x2c] sm:$0xf] %v3504_v28  ;;  %v3501_v6 = vcombine.low %v3105_v62, %v3105_v62  ;;  %v3502_v8 = vcombine.high %v3105_v62, %v3105_v62 }
 0x402   : > { %3173 = vst [vmem:[%s4144_s13 + $0x20] sm:$0xf] %v3501_v6  ;;  %3174 = vst [vmem:[%s4144_s13 + $0x24] sm:$0xf] %v3502_v8 }
 0x422   : > { %v3747_v9 = vpop.f32.mrf.mxu1 }
 0x423   : > { %vm2992_vm2 = vcmp.ge.f32.partialorder %v3747_v9, %v5367_v48 }
 0x424   : > { %v2956_v10 = vpop.f32.mrf.mxu1  ;;  %v3481_v39 = vsel %vm2992_vm2, 1.0, %v4020_v23 }
 0x425   : > { %vm2990_vm8 = vcmp.ge.f32.partialorder %v2956_v10, %v5367_v48 }
 0x426   : > { %v3748_v25 = vpop.f32.mrf.mxu1  ;;  %v3479_v54 = vsel %vm2990_vm8, 1.0, %v4020_v23 }
 0x427   : > { %vm2993_vm9 = vcmp.ge.f32.partialorder %v3748_v25, %v5367_v48 }
 0x428   : > { %v3482_v37 = vsel %vm2993_vm9, 1.0, %v4020_v23  ;;  %v2959_v60 = vpop.f32.mrf.mxu1 }
 0x429   : > { %v3033_v4 = vpack.c.bf16 %v3482_v37, %v3481_v39  ;;  %vm2991_vm10 = vcmp.ge.f32.partialorder %v2959_v60, %v5367_v48 }
 0x42a   : > { %v3480_v38 = vsel %vm2991_vm10, 1.0, %v4020_v23 }
 0x42b   : > { %v3108_v43 = vadd.bf16 %v3919_v19, %v3033_v4  ;;  %v3032_v26 = vpack.c.bf16 %v3480_v38, %v3479_v54 }
 0x42d   : > { %v3507_v61 = vcombine.low %v3108_v43, %v3108_v43  ;;  %v3508_v41 = vcombine.high %v3108_v43, %v3108_v43  ;;  %v3107_v13 = vadd.bf16 %v3920_v45, %v3032_v26 }
 0x42f   : > { %3179 = vst [vmem:[%s4144_s13 + $0x38] sm:$0xf] %v3507_v61  ;;  %3180 = vst [vmem:[%s4144_s13 + $0x3c] sm:$0xf] %v3508_v41  ;;  %v3505_v48 = vcombine.low %v3107_v13, %v3107_v13  ;;  %v3506_v49 = vcombine.high %v3107_v13, %v3107_v13 }
 0x431   : > { %3177 = vst [vmem:[%s4144_s13 + $0x30] sm:$0xf] %v3505_v48  ;;  %3178 = vst [vmem:[%s4144_s13 + $0x34] sm:$0xf] %v3506_v49 }
 0x432   : > { %3934 = shalt.err (!%p3931_p7)
}
 0x433   : > { %s3935_s20 = scalar_lea.hbm %s5427_s11, 1024  ;;  %s3939_s27 = scalar_lea.hbm %s5497_s7, 4096 }
 0x434   : > { %p3936_p9 = scmp.ne.s32.totalorder %s5427_s11, %s3935_s20  ;;  %p3940_p12 = scmp.lt.s32.totalorder %s5427_s11, %s5497_s7 }
 0x435   : > { %p3941_p13 = scmp.lt.s32.totalorder %s3939_s27, %s3935_s20 }
 0x436   : > { %p3937_p10 = pnand %p3936_p9, %p4114_p3 }
 0x437   : > { %p3942_p0 = por %p3941_p13, %p3940_p12 }
 0x438   : > { %p3938_p11 = pneg %p3937_p10 }
 0x43a   : > { %p3943_p1 = pnand %p3942_p0, %p3938_p11 }
 0x43c   : > { %3946 = shalt.err (!%p3943_p1)
}
 0x43d   : > { %s4022_s12 = smov 4  }
 0x43e   : > { %3765 = dma.vmem_to_hbm [thread:$0]  (%p4114_p3), %s5431_s28, 1024, %s5427_s11, %s5437_s21, %s4018_s10, %s4018_s10, %s4022_s12  }
 0x43f PF: > { %p3771_p2 = scmp.ge.s32.totalorder %s4013_s8, 2  ;;  %s3213_s18 = sand.u32 1, %s3985_s24  }
 0x440   : > { %s3214_s22 = scalar_lea.sflag [#allocation5], %s3213_s18 }
 0x441   : > { %p3768_p4 = pnand %p3771_p2, %p4123_p8 }
 0x443   : > { %p3769_p5 = pneg %p3768_p4 }
 0x445   : > { %3980 = dma.done.wait (%p3769_p5), %s3214_s22, 1024  }
 0x446   : > { %3982 = vsyncadd (%p3769_p5), %s3214_s22, 4294966272  ;;  %s20_s8 = sadd.s32 1, %s4013_s8   ;;  %s5516_s14 = sld [smem:[#allocation7_spill]] }
 0x447   : > { %p17_p6 = scmp.ge.s32.totalorder %s20_s8, 6   ;;  %s5517_s10 = sld [smem:[#allocation8_spill]] }
 0x448   : > { %s5518_s24 = smov %s3989_s25  ;;  %s5519_s25 = smov %s3993_s26 }
 0x449   : > { %s5520_s26 = smov %s4132_s19  ;;  %s5521_s27 = smov %s4005_s29 }
 0x44a   : > { %s5522_s28 = smov %s4009_s30  ;;  %19 = sbr.rel (!%p17_p6) target bundleno = 5 (0x5), region = 91 }
 0x44c   : > { %s5523_s29 = smov %s5516_s14 }
 0x44d   : > { %s5524_s30 = smov %s5517_s10 }
 0x44f   :  { %3219 = vsyncpa [#allocation5], 1 }
 0x450   :  { %3221 = vsyncpa [#allocation5 + $0x1], 1 }

</bundles_post_ra>
